<compile_context>
chip_gen: v7x
topology: tpu7x:2x2x1
jax: 0.10.0
libtpu: 0.0.40
codegen_flags: <defaults>
</compile_context>

<pallas_src>
import jax
import jax.numpy as jnp
from jax import lax
from jax.experimental import pallas as pl
from jax.experimental.pallas import tpu as pltpu

IMG_FEATURE_DIM = 1024
AZI_CLASSES, ELE_CLASSES, INP_CLASSES = 24, 12, 24
BN_EPS = 1e-5

BACKBONE_DIM = 512  # resnet18 pooled feature width

# Lane-aligned (multiple-of-128) padded hidden widths.
H1_PAD = 896    # 800 -> 896
H2_PAD = 512    # 400 -> 512
H3_PAD = 256    # 200 -> 256
HEAD_OUT = AZI_CLASSES + ELE_CLASSES + INP_CLASSES + AZI_CLASSES + ELE_CLASSES + INP_CLASSES  # 120
HEAD_PAD = 128  # 120 -> 128


# ----------------------------- Pallas head kernel ---------------------------
def _head_kernel(x_ref,
                 w1_ref, b1_ref, w2_ref, b2_ref, w3_ref, b3_ref,
                 wh_ref, bh_ref,
                 out_ref):
    # x: [Bp, 512] bf16; weights bf16; biases f32; MXU accumulates in f32.
    x = x_ref[...]
    # layer 1: (resnet fc folded into compress Linear 1) + folded BN + ReLU
    h = jnp.maximum(
        jnp.dot(x, w1_ref[...], preferred_element_type=jnp.float32) + b1_ref[...], 0.0)
    # layer 2: Linear + folded BN + ReLU
    h = jnp.maximum(
        jnp.dot(h.astype(jnp.bfloat16), w2_ref[...],
                preferred_element_type=jnp.float32) + b2_ref[...], 0.0)
    # layer 3: Linear + folded BN + ReLU
    h = jnp.maximum(
        jnp.dot(h.astype(jnp.bfloat16), w3_ref[...],
                preferred_element_type=jnp.float32) + b3_ref[...], 0.0)
    # all six heads fused into one lane-dense 256 -> 128 matmul
    out_ref[...] = (jnp.dot(h.astype(jnp.bfloat16), wh_ref[...],
                            preferred_element_type=jnp.float32) + bh_ref[...])


def _full_spec(shape):
    # Block == full array (allowed regardless of (8,128) divisibility).
    nd = len(shape)
    return pl.BlockSpec(shape, lambda i, _nd=nd: (0,) * _nd)


def run_head(pooled, head_params):
    """pooled: [B, 512] f32; head_params: 8 arrays (bf16 weights, f32 biases)."""
    B, F = pooled.shape
    Bp = max(8, ((B + 7) // 8) * 8)  # pad batch / sublane dim to a multiple of 8
    x = jnp.zeros((Bp, F), jnp.bfloat16).at[:B].set(pooled.astype(jnp.bfloat16))

    inputs = (x,) + tuple(head_params)

    flops = 2 * Bp * (F * H1_PAD + H1_PAD * H2_PAD + H2_PAD * H3_PAD + H3_PAD * HEAD_PAD)
    bytes_accessed = sum(int(a.size) * a.dtype.itemsize for a in inputs) + Bp * HEAD_PAD * 4

    out = pl.pallas_call(
        _head_kernel,
        out_shape=jax.ShapeDtypeStruct((Bp, HEAD_PAD), jnp.float32),
        grid=(1,),
        in_specs=[_full_spec(a.shape) for a in inputs],
        out_specs=_full_spec((Bp, HEAD_PAD)),
        compiler_params=pltpu.CompilerParams(
            dimension_semantics=("arbitrary",),
            vmem_limit_bytes=32 * 1024 * 1024),
        cost_estimate=pl.CostEstimate(
            flops=flops, transcendentals=0, bytes_accessed=bytes_accessed),
    )(*inputs)

    # Slice the fused [Bp, 128] output into the six heads (real batch rows only).
    o = out[:B]
    c0 = 0
    c1 = c0 + AZI_CLASSES   # 24
    c2 = c1 + ELE_CLASSES   # 36
    c3 = c2 + INP_CLASSES   # 60
    c4 = c3 + AZI_CLASSES   # 84
    c5 = c4 + ELE_CLASSES   # 96
    c6 = c5 + INP_CLASSES   # 120
    return (o[:, c0:c1], o[:, c1:c2], o[:, c2:c3],
            o[:, c3:c4], o[:, c4:c5], o[:, c5:c6])


# ------------------------- ResNet18 backbone (JAX glue) ----------------------
# TODO(synk): the conv backbone is plain-JAX lax.conv glue, not a hand-written Pallas conv.
def _conv(x, w, stride, pad):
    return lax.conv_general_dilated(
        x, w, (stride, stride), ((pad, pad), (pad, pad)),
        dimension_numbers=("NCHW", "OIHW", "NCHW"))


def _bn_apply(x, scale_shift):
    scale, shift = scale_shift
    return x * scale[None, :, None, None] + shift[None, :, None, None]


def _maxpool3x3s2(x):
    return lax.reduce_window(x, -jnp.inf, lax.max,
                             (1, 1, 3, 3), (1, 1, 2, 2),
                             ((0, 0), (0, 0), (1, 1), (1, 1)))


def _init_conv(key, out_c, in_c, k):
    fan_in = in_c * k * k
    return (jax.random.normal(key, (out_c, in_c, k, k), jnp.float32)
            * (2.0 / fan_in) ** 0.5)


def _init_bn(key, c):
    k1, k2, k3, k4 = jax.random.split(key, 4)
    gamma = 1.0 + 0.1 * jax.random.normal(k1, (c,), jnp.float32)
    beta = 0.1 * jax.random.normal(k2, (c,), jnp.float32)
    mean = 0.1 * jax.random.normal(k3, (c,), jnp.float32)
    var = 1.0 + 0.1 * jax.random.uniform(k4, (c,), jnp.float32)
    scale = gamma / jnp.sqrt(var + BN_EPS)
    shift = beta - mean * scale
    return scale, shift


def _init_linear(key, in_d, out_d):
    kw, kb = jax.random.split(key)
    s = (1.0 / in_d) ** 0.5
    w = jax.random.uniform(kw, (in_d, out_d), jnp.float32, -s, s)
    b = jax.random.uniform(kb, (1, out_d), jnp.float32, -s, s)
    return w, b


def _init_basic_block(key, in_c, out_c, stride):
    ks = jax.random.split(key, 6)
    p = {
        "conv1": _init_conv(ks[0], out_c, in_c, 3),
        "bn1": _init_bn(ks[1], out_c),
        "conv2": _init_conv(ks[2], out_c, out_c, 3),
        "bn2": _init_bn(ks[3], out_c),
    }
    if stride != 1 or in_c != out_c:
        p["down_conv"] = _init_conv(ks[4], out_c, in_c, 1)
        p["down_bn"] = _init_bn(ks[5], out_c)
    return p


def _basic_block(x, p, stride):
    out = _conv(x, p["conv1"], stride, 1)
    out = jnp.maximum(_bn_apply(out, p["bn1"]), 0.0)
    out = _conv(out, p["conv2"], 1, 1)
    out = _bn_apply(out, p["bn2"])
    if "down_conv" in p:
        idn = _bn_apply(_conv(x, p["down_conv"], stride, 0), p["down_bn"])
    else:
        idn = x
    return jnp.maximum(out + idn, 0.0)


_BLOCK_CFG = [(64, 64, 1), (64, 64, 1), (64, 128, 2), (128, 128, 1),
              (128, 256, 2), (256, 256, 1), (256, 512, 2), (512, 512, 1)]


def init_resnet18(key):
    ks = jax.random.split(key, 2 + len(_BLOCK_CFG))
    params = {"conv1": _init_conv(ks[0], 64, 3, 7), "bn1": _init_bn(ks[1], 64)}
    params["blocks"] = [
        _init_basic_block(ks[2 + i], ic, oc, st)
        for i, (ic, oc, st) in enumerate(_BLOCK_CFG)
    ]
    return params


def resnet18_features(im, params):
    out = _conv(im, params["conv1"], 2, 3)
    out = jnp.maximum(_bn_apply(out, params["bn1"]), 0.0)
    out = _maxpool3x3s2(out)
    for p, (_, _, st) in zip(params["blocks"], _BLOCK_CFG):
        out = _basic_block(out, p, st)
    # adaptive avg pool to 1x1 + flatten -> [B, 512]
    return jnp.mean(out, axis=(2, 3))


# ------------------------- Head parameter construction -----------------------
def _pad_to(a, target_shape):
    pads = [(0, t - s) for s, t in zip(a.shape, target_shape)]
    return jnp.pad(a, pads)


def init_head(key):
    """Builds head params with exact eval-mode BN folding, exact folding of the
    resnet fc into the first compress Linear, zero-padding of the hidden widths
    to lane-aligned sizes, six-head fusion, and bf16 weights."""
    ks = jax.random.split(key, 13)
    wfc, bfc = _init_linear(ks[0], BACKBONE_DIM, IMG_FEATURE_DIM)  # resnet18 final fc

    def folded_linear(kw, kbn, in_d, out_d):
        w, b = _init_linear(kw, in_d, out_d)
        scale, shift = _init_bn(kbn, out_d)
        # exact eval-mode BN fold: BN(xW + b) = x(W*scale) + (b*scale + shift)
        return w * scale[None, :], b * scale[None, :] + shift[None, :]

    w1, b1 = folded_linear(ks[1], ks[2], IMG_FEATURE_DIM, 800)
    w2, b2 = folded_linear(ks[3], ks[4], 800, 400)
    w3, b3 = folded_linear(ks[5], ks[6], 400, 200)
    wca, bca = _init_linear(ks[7], 200, AZI_CLASSES)
    wce, bce = _init_linear(ks[8], 200, ELE_CLASSES)
    wci, bci = _init_linear(ks[9], 200, INP_CLASSES)
    wra, bra = _init_linear(ks[10], 200, AZI_CLASSES)
    wre, bre = _init_linear(ks[11], 200, ELE_CLASSES)
    wri, bri = _init_linear(ks[12], 200, INP_CLASSES)

    # Fold resnet fc into the first compress Linear (no nonlinearity between):
    #   (x @ Wfc + bfc) @ W1 + b1  ==  x @ (Wfc @ W1) + (bfc @ W1 + b1)
    # Done in f32 before any bf16 cast; halves the kernel's weight DMA.
    w1_eff = wfc @ w1                    # (512, 800)
    b1_eff = bfc @ w1 + b1               # (1, 800)

    # Zero-pad hidden widths (ReLU + zero bias keeps padded lanes exactly 0).
    w1p = _pad_to(w1_eff, (BACKBONE_DIM, H1_PAD))
    b1p = _pad_to(b1_eff, (1, H1_PAD))
    w2p = _pad_to(w2, (H1_PAD, H2_PAD))
    b2p = _pad_to(b2, (1, H2_PAD))
    w3p = _pad_to(w3, (H2_PAD, H3_PAD))
    b3p = _pad_to(b3, (1, H3_PAD))

    # Fuse the six heads into one lane-dense 256 -> 128 matmul.
    wh = jnp.concatenate([wca, wce, wci, wra, wre, wri], axis=1)   # (200, 120)
    bh = jnp.concatenate([bca, bce, bci, bra, bre, bri], axis=1)   # (1, 120)
    whp = _pad_to(wh, (H3_PAD, HEAD_PAD))
    bhp = _pad_to(bh, (1, HEAD_PAD))

    # Weights in bf16 (halves HBM->VMEM bytes: the kernel is DMA-bound);
    # biases stay f32, accumulation is f32 inside the kernel.
    return (w1p.astype(jnp.bfloat16), b1p,
            w2p.astype(jnp.bfloat16), b2p,
            w3p.astype(jnp.bfloat16), b3p,
            whp.astype(jnp.bfloat16), bhp)


# --------------------------------- forward -----------------------------------
def baseline_estimator_forward(im, resnet_params, head_params):
    pooled = resnet18_features(im, resnet_params)      # [B, 512]
    return run_head(pooled, head_params)               # 6 outputs


if __name__ == "__main__":
    key = jax.random.PRNGKey(0)
    k_img, k_res, k_head = jax.random.split(key, 3)

    B, C, H, W = 2, 3, 32, 32
    im = jax.random.normal(k_img, (B, C, H, W), jnp.float32)

    resnet_params = init_resnet18(k_res)
    head_params = init_head(k_head)

    outs = baseline_estimator_forward(im, resnet_params, head_params)
    outs = jax.block_until_ready(outs)

    cls_azi, cls_ele, cls_inp, reg_azi, reg_ele, reg_inp = outs
    assert cls_azi.shape == (B, AZI_CLASSES)
    assert cls_ele.shape == (B, ELE_CLASSES)
    assert cls_inp.shape == (B, INP_CLASSES)
    assert reg_azi.shape == (B, AZI_CLASSES)
    assert reg_ele.shape == (B, ELE_CLASSES)
    assert reg_inp.shape == (B, INP_CLASSES)
    assert all(bool(jnp.all(jnp.isfinite(o))) for o in outs)

    print("KERNEL_OK")
</pallas_src>

<mosaic_0001>
module attributes {stable_mosaic.version = 11 : i64} {
  func.func @_head_kernel(%arg0: i32, %arg1: memref<8x512xbf16, #tpu.memory_space<vmem>>, %arg2: memref<512x896xbf16, #tpu.memory_space<vmem>>, %arg3: memref<1x896xf32, #tpu.memory_space<vmem>>, %arg4: memref<896x512xbf16, #tpu.memory_space<vmem>>, %arg5: memref<1x512xf32, #tpu.memory_space<vmem>>, %arg6: memref<512x256xbf16, #tpu.memory_space<vmem>>, %arg7: memref<1x256xf32, #tpu.memory_space<vmem>>, %arg8: memref<256x128xbf16, #tpu.memory_space<vmem>>, %arg9: memref<1x128xf32, #tpu.memory_space<vmem>>, %arg10: memref<8x128xf32, #tpu.memory_space<vmem>>) attributes {dimension_semantics = [#tpu.dimension_semantics<arbitrary>], iteration_bounds = array<i64: 1>, scalar_prefetch = 0 : i64, scratch_operands = 0 : i64, tpu.core_type = #tpu.core_type<tc>, window_params = [{pipeline_mode = #tpu.pipeline_mode<synchronous>, transform_indices = @transform_0, window_bounds = array<i64: 8, 512>}, {pipeline_mode = #tpu.pipeline_mode<synchronous>, transform_indices = @transform_1, window_bounds = array<i64: 512, 896>}, {pipeline_mode = #tpu.pipeline_mode<synchronous>, transform_indices = @transform_2, window_bounds = array<i64: 1, 896>}, {pipeline_mode = #tpu.pipeline_mode<synchronous>, transform_indices = @transform_3, window_bounds = array<i64: 896, 512>}, {pipeline_mode = #tpu.pipeline_mode<synchronous>, transform_indices = @transform_4, window_bounds = array<i64: 1, 512>}, {pipeline_mode = #tpu.pipeline_mode<synchronous>, transform_indices = @transform_5, window_bounds = array<i64: 512, 256>}, {pipeline_mode = #tpu.pipeline_mode<synchronous>, transform_indices = @transform_6, window_bounds = array<i64: 1, 256>}, {pipeline_mode = #tpu.pipeline_mode<synchronous>, transform_indices = @transform_7, window_bounds = array<i64: 256, 128>}, {pipeline_mode = #tpu.pipeline_mode<synchronous>, transform_indices = @transform_8, window_bounds = array<i64: 1, 128>}, {pipeline_mode = #tpu.pipeline_mode<synchronous>, transform_indices = @transform_9, window_bounds = array<i64: 8, 128>}]} {
    %c0 = arith.constant 0 : index
    %c0_0 = arith.constant 0 : index
    %0 = vector.load %arg1[%c0, %c0_0] : memref<8x512xbf16, #tpu.memory_space<vmem>>, vector<8x512xbf16>
    %c0_1 = arith.constant 0 : index
    %c0_2 = arith.constant 0 : index
    %1 = vector.load %arg2[%c0_1, %c0_2] : memref<512x896xbf16, #tpu.memory_space<vmem>>, vector<512x896xbf16>
    %cst = arith.constant dense<0.000000e+00> : vector<8x896xf32>
    %2 = tpu.matmul %0, %1, %cst {dimension_numbers = #tpu.dot_dimension_numbers<[1], [0], [0], [1], [0, 0, 1, 1], [], []>} : vector<8x512xbf16>, vector<512x896xbf16>, vector<8x896xf32> -> vector<8x896xf32>
    %c0_3 = arith.constant 0 : index
    %c0_4 = arith.constant 0 : index
    %3 = vector.load %arg3[%c0_3, %c0_4] : memref<1x896xf32, #tpu.memory_space<vmem>>, vector<1x896xf32>
    %4 = vector.broadcast %3 : vector<1x896xf32> to vector<8x896xf32>
    %5 = arith.addf %2, %4 : vector<8x896xf32>
    %cst_5 = arith.constant 0.000000e+00 : f32
    %6 = vector.broadcast %cst_5 : f32 to vector<8x896xf32>
    %7 = arith.maximumf %5, %6 : vector<8x896xf32>
    %8 = arith.truncf %7 : vector<8x896xf32> to vector<8x896xbf16>
    %c0_6 = arith.constant 0 : index
    %c0_7 = arith.constant 0 : index
    %9 = vector.load %arg4[%c0_6, %c0_7] : memref<896x512xbf16, #tpu.memory_space<vmem>>, vector<896x512xbf16>
    %cst_8 = arith.constant dense<0.000000e+00> : vector<8x512xf32>
    %10 = tpu.matmul %8, %9, %cst_8 {dimension_numbers = #tpu.dot_dimension_numbers<[1], [0], [0], [1], [0, 0, 1, 1], [], []>} : vector<8x896xbf16>, vector<896x512xbf16>, vector<8x512xf32> -> vector<8x512xf32>
    %c0_9 = arith.constant 0 : index
    %c0_10 = arith.constant 0 : index
    %11 = vector.load %arg5[%c0_9, %c0_10] : memref<1x512xf32, #tpu.memory_space<vmem>>, vector<1x512xf32>
    %12 = vector.broadcast %11 : vector<1x512xf32> to vector<8x512xf32>
    %13 = arith.addf %10, %12 : vector<8x512xf32>
    %cst_11 = arith.constant 0.000000e+00 : f32
    %14 = vector.broadcast %cst_11 : f32 to vector<8x512xf32>
    %15 = arith.maximumf %13, %14 : vector<8x512xf32>
    %16 = arith.truncf %15 : vector<8x512xf32> to vector<8x512xbf16>
    %c0_12 = arith.constant 0 : index
    %c0_13 = arith.constant 0 : index
    %17 = vector.load %arg6[%c0_12, %c0_13] : memref<512x256xbf16, #tpu.memory_space<vmem>>, vector<512x256xbf16>
    %cst_14 = arith.constant dense<0.000000e+00> : vector<8x256xf32>
    %18 = tpu.matmul %16, %17, %cst_14 {dimension_numbers = #tpu.dot_dimension_numbers<[1], [0], [0], [1], [0, 0, 1, 1], [], []>} : vector<8x512xbf16>, vector<512x256xbf16>, vector<8x256xf32> -> vector<8x256xf32>
    %c0_15 = arith.constant 0 : index
    %c0_16 = arith.constant 0 : index
    %19 = vector.load %arg7[%c0_15, %c0_16] : memref<1x256xf32, #tpu.memory_space<vmem>>, vector<1x256xf32>
    %20 = vector.broadcast %19 : vector<1x256xf32> to vector<8x256xf32>
    %21 = arith.addf %18, %20 : vector<8x256xf32>
    %cst_17 = arith.constant 0.000000e+00 : f32
    %22 = vector.broadcast %cst_17 : f32 to vector<8x256xf32>
    %23 = arith.maximumf %21, %22 : vector<8x256xf32>
    %24 = arith.truncf %23 : vector<8x256xf32> to vector<8x256xbf16>
    %c0_18 = arith.constant 0 : index
    %c0_19 = arith.constant 0 : index
    %25 = vector.load %arg8[%c0_18, %c0_19] : memref<256x128xbf16, #tpu.memory_space<vmem>>, vector<256x128xbf16>
    %cst_20 = arith.constant dense<0.000000e+00> : vector<8x128xf32>
    %26 = tpu.matmul %24, %25, %cst_20 {dimension_numbers = #tpu.dot_dimension_numbers<[1], [0], [0], [1], [0, 0, 1, 1], [], []>} : vector<8x256xbf16>, vector<256x128xbf16>, vector<8x128xf32> -> vector<8x128xf32>
    %c0_21 = arith.constant 0 : index
    %c0_22 = arith.constant 0 : index
    %27 = vector.load %arg9[%c0_21, %c0_22] : memref<1x128xf32, #tpu.memory_space<vmem>>, vector<1x128xf32>
    %28 = vector.broadcast %27 : vector<1x128xf32> to vector<8x128xf32>
    %29 = arith.addf %26, %28 : vector<8x128xf32>
    %c0_23 = arith.constant 0 : index
    %c0_24 = arith.constant 0 : index
    %30 = vector.load %arg10[%c0_23, %c0_24] : memref<8x128xf32, #tpu.memory_space<vmem>>, vector<8x128xf32>
    tpu.vector_store %arg10[%c0_23, %c0_24], %29 {strides = array<i32>} : memref<8x128xf32, #tpu.memory_space<vmem>>, vector<8x128xf32>,
    return
  }
  func.func @transform_0(%arg0: i32) -> (i32, i32) {
    %c0_i32 = arith.constant 0 : i32
    %c0_i32_0 = arith.constant 0 : i32
    %c0_i32_1 = arith.constant 0 : i32
    return %c0_i32, %c0_i32_0 : i32, i32
  }
  func.func @transform_1(%arg0: i32) -> (i32, i32) {
    %c0_i32 = arith.constant 0 : i32
    %c0_i32_0 = arith.constant 0 : i32
    %c0_i32_1 = arith.constant 0 : i32
    return %c0_i32, %c0_i32_0 : i32, i32
  }
  func.func @transform_2(%arg0: i32) -> (i32, i32) {
    %c0_i32 = arith.constant 0 : i32
    %c0_i32_0 = arith.constant 0 : i32
    %c0_i32_1 = arith.constant 0 : i32
    return %c0_i32, %c0_i32_0 : i32, i32
  }
  func.func @transform_3(%arg0: i32) -> (i32, i32) {
    %c0_i32 = arith.constant 0 : i32
    %c0_i32_0 = arith.constant 0 : i32
    %c0_i32_1 = arith.constant 0 : i32
    return %c0_i32, %c0_i32_0 : i32, i32
  }
  func.func @transform_4(%arg0: i32) -> (i32, i32) {
    %c0_i32 = arith.constant 0 : i32
    %c0_i32_0 = arith.constant 0 : i32
    %c0_i32_1 = arith.constant 0 : i32
    return %c0_i32, %c0_i32_0 : i32, i32
  }
  func.func @transform_5(%arg0: i32) -> (i32, i32) {
    %c0_i32 = arith.constant 0 : i32
    %c0_i32_0 = arith.constant 0 : i32
    %c0_i32_1 = arith.constant 0 : i32
    return %c0_i32, %c0_i32_0 : i32, i32
  }
  func.func @transform_6(%arg0: i32) -> (i32, i32) {
    %c0_i32 = arith.constant 0 : i32
    %c0_i32_0 = arith.constant 0 : i32
    %c0_i32_1 = arith.constant 0 : i32
    return %c0_i32, %c0_i32_0 : i32, i32
  }
  func.func @transform_7(%arg0: i32) -> (i32, i32) {
    %c0_i32 = arith.constant 0 : i32
    %c0_i32_0 = arith.constant 0 : i32
    %c0_i32_1 = arith.constant 0 : i32
    return %c0_i32, %c0_i32_0 : i32, i32
  }
  func.func @transform_8(%arg0: i32) -> (i32, i32) {
    %c0_i32 = arith.constant 0 : i32
    %c0_i32_0 = arith.constant 0 : i32
    %c0_i32_1 = arith.constant 0 : i32
    return %c0_i32, %c0_i32_0 : i32, i32
  }
  func.func @transform_9(%arg0: i32) -> (i32, i32) {
    %c0_i32 = arith.constant 0 : i32
    %c0_i32_0 = arith.constant 0 : i32
    %c0_i32_1 = arith.constant 0 : i32
    return %c0_i32, %c0_i32_0 : i32, i32
  }
}

</mosaic_0001>

<bundles_post_ra>
// kernel: tpu_custom_call.1
= control target key start
LH: loop header
LB: loop body
LE: loop exit
PB: predicated region body
PF: predicated region fallthrough
CT: control target
= control target key end

     0   :  { %14 = vsyncpa [#allocation3], 0  ;;  %s6096_s0 = inlined_call_operand.hbm [shape: bf16[8,512], index: 0, kind: input, shape index: {}]   ;;  %s6097_s1 = inlined_call_operand.hbm [shape: bf16[512,896], index: 1, kind: input, shape index: {}]   ;;  %s6098_s2 = inlined_call_operand.vmem [shape: f32[1,896], index: 2, kind: input, shape index: {}]   ;;  %s6099_s3 = inlined_call_operand.hbm [shape: bf16[896,512], index: 3, kind: input, shape index: {}]   ;;  %s6100_s4 = inlined_call_operand.vmem [shape: f32[1,512], index: 4, kind: input, shape index: {}]   ;;  %s6101_s5 = inlined_call_operand.hbm [shape: bf16[512,256], index: 5, kind: input, shape index: {}]   ;;  %s6102_s6 = inlined_call_operand.vmem [shape: f32[1,256], index: 6, kind: input, shape index: {}]   ;;  %s6103_s7 = inlined_call_operand.hbm [shape: bf16[256,128], index: 7, kind: input, shape index: {}]   ;;  %s6104_s8 = inlined_call_operand.vmem [shape: f32[1,128], index: 8, kind: input, shape index: {}]   ;;  %s6105_s9 = inlined_call_operand.hbm [shape: f32[8,128], index: 9, kind: output, shape index: {}]  }
   0x1   :  { %15 = vsyncpa [#allocation6], 0 }
   0x2   :  { %16 = vsyncpa [#allocation9], 0 }
   0x3   :  { %17 = vsyncpa [#allocation4], 0  ;;  %s5856_s30 = smov [#allocation5]   ;;  %s5716_s13 = scalar_lea.hbm %s6097_s1, 28672 }
   0x4   :  { %s33_s10 = sshll.u32 %s5856_s30, 4  ;;  %p5717_p0 = scmp.ne.s32.totalorder %s6097_s1, %s5716_s13  ;;  %s34_s10 = int_to_ptr.vmem [resolvable:$true] %s33_s10 }
   0x5   :  { %p5720_p1 = scmp.lt.u32.totalorder %s5716_s13, %s6097_s1 }
   0x7   :  { %p5722_p2 = pnand %p5720_p1, %p5717_p0 }
   0x9   :  { %5725 = shalt.err (!%p5722_p2)
}
   0xa   :  { %s5726_s18 = scalar_lea.vmem %s34_s10, 28672  ;;  %p5731_p4 = scmp.lt.s32.totalorder %s34_s10, %s34_s10 }
   0xb   :  { %p5727_p3 = scmp.ne.s32.totalorder %s34_s10, %s5726_s18  ;;  %p5732_p5 = scmp.lt.s32.totalorder %s5726_s18, %s5726_s18 }
   0xd   :  { %p5733_p6 = por %p5732_p5, %p5731_p4 }
   0xf   :  { %p5734_p7 = pnand %p5733_p6, %p5727_p3 }
  0x11   :  { %5737 = shalt.err (!%p5734_p7)
}
  0x12   :  { %s5857_s19 = smov 448   ;;  %s5858_s20 = smov 28  }
  0x13   :  { %39 = dma.hbm_to_vmem [thread:$0]  %s6097_s1, 28672, %s34_s10, [#allocation6], %s5857_s19, %s5857_s19, %s5858_s20  }
  0x14   :  { %s5859_s23 = smov [#allocation8]   ;;  %s5738_s27 = scalar_lea.hbm %s6101_s5, 8192 }
  0x15   :  { %s61_s24 = sshll.u32 %s5859_s23, 4  ;;  %p5739_p8 = scmp.ne.s32.totalorder %s6101_s5, %s5738_s27  ;;  %s62_s24 = int_to_ptr.vmem [resolvable:$true] %s61_s24 }
  0x16   :  { %p5742_p9 = scmp.lt.u32.totalorder %s5738_s27, %s6101_s5 }
  0x18   :  { %p5744_p10 = pnand %p5742_p9, %p5739_p8 }
  0x1a   :  { %5747 = shalt.err (!%p5744_p10)
}
  0x1b   :  { %s5748_s12 = scalar_lea.vmem %s62_s24, 8192  ;;  %p5753_p12 = scmp.lt.s32.totalorder %s62_s24, %s62_s24 }
  0x1c   :  { %p5749_p11 = scmp.ne.s32.totalorder %s62_s24, %s5748_s12  ;;  %p5754_p13 = scmp.lt.s32.totalorder %s5748_s12, %s5748_s12 }
  0x1e   :  { %p5755_p0 = por %p5754_p13, %p5753_p12 }
  0x20   :  { %p5756_p1 = pnand %p5755_p0, %p5749_p11 }
  0x22   :  { %5759 = shalt.err (!%p5756_p1)
}
  0x23   :  { %s5860_s1 = smov 128   ;;  %s5861_s10 = smov 8  }
  0x24   :  { %67 = dma.hbm_to_vmem [thread:$0]  %s6101_s5, 8192, %s62_s24, [#allocation9], %s5860_s1, %s5860_s1, %s5861_s10  }
  0x25   :  { %s5862_s15 = smov [#allocation2]   ;;  %s5863_s17 = smov [#allocation7]  }
  0x26   :  { %s24_s16 = sshll.u32 %s5862_s15, 4  ;;  %s47_s18 = sshll.u32 %s5863_s17, 4  ;;  %s25_s16 = int_to_ptr.vmem [resolvable:$true] %s24_s16  ;;  %s5945_s18 = int_to_ptr.vmem [resolvable:$true] %s47_s18 }
  0x27   :  { %s5760_s21 = scalar_lea.hbm %s6096_s0, 256 }
  0x28   :  { %p5761_p2 = scmp.ne.s32.totalorder %s6096_s0, %s5760_s21  ;;  %p5764_p3 = scmp.lt.u32.totalorder %s5760_s21, %s6096_s0 }
  0x2a   :  { %p5766_p4 = pnand %p5764_p3, %p5761_p2 }
  0x2c   :  { %5769 = shalt.err (!%p5766_p4)
}
  0x2d   :  { %s5770_s5 = scalar_lea.vmem %s25_s16, 256  ;;  %p5775_p6 = scmp.lt.s32.totalorder %s25_s16, %s25_s16 }
  0x2e   :  { %p5771_p5 = scmp.ne.s32.totalorder %s25_s16, %s5770_s5  ;;  %p5776_p7 = scmp.lt.s32.totalorder %s5770_s5, %s5770_s5 }
  0x30   :  { %p5777_p8 = por %p5776_p7, %p5775_p6 }
  0x32   :  { %p5778_p9 = pnand %p5777_p8, %p5771_p5 }
  0x34   :  { %5781 = shalt.err (!%p5778_p9)
}
  0x35   :  { %27 = dma.hbm_to_vmem [thread:$0]  %s6096_s0, 256, %s25_s16, [#allocation3]  }
  0x36   :  { %s5782_s30 = scalar_lea.hbm %s6099_s3, 28672 }
  0x37   :  { %p5783_p10 = scmp.ne.s32.totalorder %s6099_s3, %s5782_s30  ;;  %p5786_p11 = scmp.lt.u32.totalorder %s5782_s30, %s6099_s3 }
  0x39   :  { %p5788_p12 = pnand %p5786_p11, %p5783_p10 }
  0x3b   :  { %5791 = shalt.err (!%p5788_p12)
}
  0x3c   :  { %s5792_s13 = scalar_lea.vmem %s5945_s18, 28672  ;;  %p5797_p0 = scmp.lt.s32.totalorder %s5945_s18, %s5945_s18 }
  0x3d   :  { %p5793_p13 = scmp.ne.s32.totalorder %s5945_s18, %s5792_s13  ;;  %p5798_p1 = scmp.lt.s32.totalorder %s5792_s13, %s5792_s13 }
  0x3f   :  { %p5799_p2 = por %p5798_p1, %p5797_p0 }
  0x41   :  { %p5800_p3 = pnand %p5799_p2, %p5793_p13 }
  0x43   :  { %5803 = shalt.err (!%p5800_p3)
}
  0x44   :  { %s5864_s0 = smov 256   ;;  %s5865_s14 = smov 16  }
  0x45   :  { %53 = dma.hbm_to_vmem [thread:$0]  %s6099_s3, 28672, %s5945_s18, [#allocation6], %s5864_s0, %s5864_s0, %s5865_s14  }
  0x46   :  { %s5866_s17 = smov [#allocation10]   ;;  %s5804_s22 = scalar_lea.hbm %s6103_s7, 2048 }
  0x47   :  { %s75_s19 = sshll.u32 %s5866_s17, 4  ;;  %p5805_p4 = scmp.ne.s32.totalorder %s6103_s7, %s5804_s22  ;;  %s76_s19 = int_to_ptr.vmem [resolvable:$true] %s75_s19 }
  0x48   :  { %p5808_p5 = scmp.lt.u32.totalorder %s5804_s22, %s6103_s7 }
  0x4a   :  { %p5810_p6 = pnand %p5808_p5, %p5805_p4 }
  0x4c   :  { %5813 = shalt.err (!%p5810_p6)
}
  0x4d   :  { %s5814_s24 = scalar_lea.vmem %s76_s19, 2048  ;;  %p5819_p8 = scmp.lt.s32.totalorder %s76_s19, %s76_s19 }
  0x4e   :  { %p5815_p7 = scmp.ne.s32.totalorder %s76_s19, %s5814_s24  ;;  %p5820_p9 = scmp.lt.s32.totalorder %s5814_s24, %s5814_s24 }
  0x50   :  { %p5821_p10 = por %p5820_p9, %p5819_p8 }
  0x52   :  { %p5822_p11 = pnand %p5821_p10, %p5815_p7 }
  0x54   :  { %5825 = shalt.err (!%p5822_p11)
}
  0x55   :  { %s5867_s3 = smov 64   ;;  %s5868_s18 = smov 4  }
  0x56   :  { %81 = dma.hbm_to_vmem [thread:$0]  %s6103_s7, 2048, %s76_s19, [#allocation9], %s5867_s3, %s5867_s3, %s5868_s18  }
  0x57   :  { %5848 = dma.done.wait [#allocation3], 256  }
  0x58   :  { %5849 = vsyncadd [#allocation3], 4294967040 }
  0x59   :  { %5850 = dma.done.wait [#allocation6], 57344  }
  0x5a   :  { %5851 = vsyncadd [#allocation6], 4294909952 }
  0x5b   :  { %5852 = dma.done.wait [#allocation9], 10240  }
  0x5c   :  { %5853 = vsyncadd [#allocation9], 4294957056  ;;  %v4944_v0 = vld [vmem:[#allocation5 + $0x4] ss:$28 sps:$4 sm:$0xff]   ;;  %v4946_v1 = vld [vmem:[#allocation5 + $0xc] ss:$28 sps:$4 sm:$0xff]  }
  0x5d   :  { %1561 = vmatprep.subr.bf16.mxu0 %v4944_v0  ;;  %v4948_v2 = vld [vmem:[#allocation5] ss:$28 sps:$4 sm:$0xff]   ;;  %v4949_v3 = vld [vmem:[#allocation5 + $0x8] ss:$28 sps:$4 sm:$0xff]   ;;  %1643 = vmatprep.subr.bf16.mxu1 %v4946_v1  ;;  %v4954_v6 = vld [vmem:[#allocation5 + $0x38] ss:$28 sps:$4 sm:$0xff]  }
  0x5e   :  { %v4950_v4 = vld [vmem:[#allocation5 + $0x3c] ss:$28 sps:$4 sm:$0xff]   ;;  %1562 = vmatpush1.bf16.msra.mxu0 %v4948_v2  ;;  %1644 = vmatpush1.bf16.msra.mxu1 %v4949_v3  ;;  %v4952_v5 = vld [vmem:[#allocation5 + $0x44] ss:$28 sps:$4 sm:$0xff]   ;;  %v4956_v8 = vld [vmem:[#allocation5 + $0x74] ss:$28 sps:$4 sm:$0xff]  }
  0x5f   :  { %1563 = vmatprep.subr.bf16.mxu0 %v4950_v4  ;;  %v4955_v7 = vld [vmem:[#allocation5 + $0x40] ss:$28 sps:$4 sm:$0xff]   ;;  %1645 = vmatprep.subr.bf16.mxu1 %v4952_v5  ;;  %v4960_v10 = vld [vmem:[#allocation5 + $0x70] ss:$28 sps:$4 sm:$0xff]   ;;  %v4961_v11 = vld [vmem:[#allocation5 + $0x78] ss:$28 sps:$4 sm:$0xff]  }
  0x60   :  { %v4958_v9 = vld [vmem:[#allocation5 + $0x7c] ss:$28 sps:$4 sm:$0xff]   ;;  %v4962_v12 = vld [vmem:[#allocation5 + $0xac] ss:$28 sps:$4 sm:$0xff]   ;;  %v4964_v13 = vld [vmem:[#allocation5 + $0xb4] ss:$28 sps:$4 sm:$0xff]  }
  0x61   :  { %v4966_v14 = vld [vmem:[#allocation5 + $0xa8] ss:$28 sps:$4 sm:$0xff]   ;;  %v4967_v15 = vld [vmem:[#allocation5 + $0xb0] ss:$28 sps:$4 sm:$0xff]   ;;  %v4972_v18 = vld [vmem:[#allocation5 + $0xe0] ss:$28 sps:$4 sm:$0xff]  }
  0x62   :  { %1564 = vmatpush1.bf16.msra.mxu0 %v4954_v6  ;;  %1646 = vmatpush1.bf16.msra.mxu1 %v4955_v7  ;;  %v4968_v16 = vld [vmem:[#allocation5 + $0xe4] ss:$28 sps:$4 sm:$0xff]   ;;  %v4970_v17 = vld [vmem:[#allocation5 + $0xec] ss:$28 sps:$4 sm:$0xff]   ;;  %v4974_v20 = vld [vmem:[#allocation5 + $0x11c] ss:$28 sps:$4 sm:$0xff]  }
  0x63   :  { %1565 = vmatprep.subr.bf16.mxu0 %v4956_v8  ;;  %1647 = vmatprep.subr.bf16.mxu1 %v4958_v9  ;;  %v4973_v19 = vld [vmem:[#allocation5 + $0xe8] ss:$28 sps:$4 sm:$0xff]   ;;  %v4978_v22 = vld [vmem:[#allocation5 + $0x118] ss:$28 sps:$4 sm:$0xff]   ;;  %v4979_v23 = vld [vmem:[#allocation5 + $0x120] ss:$28 sps:$4 sm:$0xff]  }
  0x64   :  { %v4976_v21 = vld [vmem:[#allocation5 + $0x124] ss:$28 sps:$4 sm:$0xff]   ;;  %v4980_v24 = vld [vmem:[#allocation5 + $0x154] ss:$28 sps:$4 sm:$0xff]   ;;  %v4982_v25 = vld [vmem:[#allocation5 + $0x15c] ss:$28 sps:$4 sm:$0xff]  }
  0x65   :  { %v4984_v26 = vld [vmem:[#allocation5 + $0x150] ss:$28 sps:$4 sm:$0xff]   ;;  %v4985_v27 = vld [vmem:[#allocation5 + $0x158] ss:$28 sps:$4 sm:$0xff]   ;;  %v4990_v30 = vld [vmem:[#allocation5 + $0x188] ss:$28 sps:$4 sm:$0xff]  }
  0x66   :  { %1566 = vmatpush1.bf16.msra.mxu0 %v4960_v10  ;;  %1648 = vmatpush1.bf16.msra.mxu1 %v4961_v11  ;;  %v4986_v28 = vld [vmem:[#allocation5 + $0x18c] ss:$28 sps:$4 sm:$0xff]   ;;  %v4988_v29 = vld [vmem:[#allocation5 + $0x194] ss:$28 sps:$4 sm:$0xff]   ;;  %v4992_v32 = vld [vmem:[#allocation5 + $0x1c4] ss:$28 sps:$4 sm:$0xff]  }
  0x67   :  { %1567 = vmatprep.subr.bf16.mxu0 %v4962_v12  ;;  %1649 = vmatprep.subr.bf16.mxu1 %v4964_v13  ;;  %v4991_v31 = vld [vmem:[#allocation5 + $0x190] ss:$28 sps:$4 sm:$0xff]   ;;  %v4996_v34 = vld [vmem:[#allocation5 + $0x1c0] ss:$28 sps:$4 sm:$0xff]   ;;  %v4997_v35 = vld [vmem:[#allocation5 + $0x1c8] ss:$28 sps:$4 sm:$0xff]  }
  0x68   :  { %v4994_v33 = vld [vmem:[#allocation5 + $0x1cc] ss:$28 sps:$4 sm:$0xff]   ;;  %v4998_v36 = vld [vmem:[#allocation5 + $0x1fc] ss:$28 sps:$4 sm:$0xff]   ;;  %v5000_v37 = vld [vmem:[#allocation5 + $0x204] ss:$28 sps:$4 sm:$0xff]  }
  0x69   :  { %v5002_v38 = vld [vmem:[#allocation5 + $0x1f8] ss:$28 sps:$4 sm:$0xff]   ;;  %v5003_v39 = vld [vmem:[#allocation5 + $0x200] ss:$28 sps:$4 sm:$0xff]   ;;  %v5008_v42 = vld [vmem:[#allocation5 + $0x230] ss:$28 sps:$4 sm:$0xff]  }
  0x6a   :  { %1568 = vmatpush1.bf16.msra.mxu0 %v4966_v14  ;;  %1650 = vmatpush1.bf16.msra.mxu1 %v4967_v15  ;;  %v5004_v40 = vld [vmem:[#allocation5 + $0x234] ss:$28 sps:$4 sm:$0xff]   ;;  %v5006_v41 = vld [vmem:[#allocation5 + $0x23c] ss:$28 sps:$4 sm:$0xff]   ;;  %v5010_v44 = vld [vmem:[#allocation5 + $0x26c] ss:$28 sps:$4 sm:$0xff]  }
  0x6b   :  { %1569 = vmatprep.subr.bf16.mxu0 %v4968_v16  ;;  %1651 = vmatprep.subr.bf16.mxu1 %v4970_v17  ;;  %v5009_v43 = vld [vmem:[#allocation5 + $0x238] ss:$28 sps:$4 sm:$0xff]   ;;  %v5014_v47 = vld [vmem:[#allocation5 + $0x268] ss:$28 sps:$4 sm:$0xff]   ;;  %v5015_v49 = vld [vmem:[#allocation5 + $0x270] ss:$28 sps:$4 sm:$0xff]  }
  0x6c   :  { %v5012_v45 = vld [vmem:[#allocation5 + $0x274] ss:$28 sps:$4 sm:$0xff]   ;;  %v5016_v50 = vld [vmem:[#allocation5 + $0x2a4] ss:$28 sps:$4 sm:$0xff]   ;;  %v5018_v51 = vld [vmem:[#allocation5 + $0x2ac] ss:$28 sps:$4 sm:$0xff]  }
  0x6d   :  { %v100_v46 = vld [vmem:[#allocation2] sm:$0xff]  ;;  %v5020_v52 = vld [vmem:[#allocation5 + $0x2a0] ss:$28 sps:$4 sm:$0xff]   ;;  %v5021_v53 = vld [vmem:[#allocation5 + $0x2a8] ss:$28 sps:$4 sm:$0xff]  }
  0x6e   :  { %1570 = vmatpush1.bf16.msra.mxu0 %v4972_v18  ;;  %1652 = vmatpush1.bf16.msra.mxu1 %v4973_v19  ;;  %v5988_v48 = vcombine.high %v100_v46, %v100_v46  ;;  %v5022_v54 = vld [vmem:[#allocation5 + $0x2dc] ss:$28 sps:$4 sm:$0xff]   ;;  %v5024_v55 = vld [vmem:[#allocation5 + $0x2e4] ss:$28 sps:$4 sm:$0xff]   ;;  %v5028_v58 = vld [vmem:[#allocation5 + $0x314] ss:$28 sps:$4 sm:$0xff]   ;;  %v5992_v5 = vcombine.low %v100_v46, %v100_v46 }
  0x6f   :  { %1571 = vmatprep.subr.bf16.mxu0 %v4974_v20  ;;  %1653 = vmatprep.subr.bf16.mxu1 %v4976_v21  ;;  %v5026_v56 = vld [vmem:[#allocation5 + $0x2d8] ss:$28 sps:$4 sm:$0xff]   ;;  %v5027_v57 = vld [vmem:[#allocation5 + $0x2e0] ss:$28 sps:$4 sm:$0xff]   ;;  %v5032_v60 = vld [vmem:[#allocation5 + $0x310] ss:$28 sps:$4 sm:$0xff]  }
  0x70   :  { %1593 = vmatprep.mubr.bf16.mxu0 %v5988_v48  ;;  %1675 = vmatprep.mubr.bf16.mxu1 %v5988_v48  ;;  %v5030_v59 = vld [vmem:[#allocation5 + $0x31c] ss:$28 sps:$4 sm:$0xff]   ;;  %v5034_v62 = vld [vmem:[#allocation5 + $0x34c] ss:$28 sps:$4 sm:$0xff]   ;;  %v5036_v63 = vld [vmem:[#allocation5 + $0x354] ss:$28 sps:$4 sm:$0xff]  }
  0x71   :  { %v5033_v61 = vld [vmem:[#allocation5 + $0x318] ss:$28 sps:$4 sm:$0xff]   ;;  %v5038_v0 = vld [vmem:[#allocation5 + $0x348] ss:$28 sps:$4 sm:$0xff]   ;;  %v5039_v1 = vld [vmem:[#allocation5 + $0x350] ss:$28 sps:$4 sm:$0xff]  }
  0x72   :  { %1572 = vmatpush1.bf16.msra.mxu0 %v4978_v22  ;;  %1654 = vmatpush1.bf16.msra.mxu1 %v4979_v23  ;;  %v5043_v2 = vld [vmem:[#allocation5 + $0x384] ss:$28 sps:$4 sm:$0xff]   ;;  %v5046_v3 = vld [vmem:[#allocation5 + $0x38c] ss:$28 sps:$4 sm:$0xff]   ;;  %v5050_v7 = vld [vmem:[#allocation5 + $0x3bc] ss:$28 sps:$4 sm:$0xff]  }
  0x73   :  { %1573 = vmatprep.subr.bf16.mxu0 %v4980_v24  ;;  %1655 = vmatprep.subr.bf16.mxu1 %v4982_v25  ;;  %v5041_v4 = vld [vmem:[#allocation5 + $0x380] ss:$28 sps:$4 sm:$0xff]   ;;  %v5044_v6 = vld [vmem:[#allocation5 + $0x388] ss:$28 sps:$4 sm:$0xff]   ;;  %v5048_v9 = vld [vmem:[#allocation5 + $0x3b8] ss:$28 sps:$4 sm:$0xff]  }
  0x74   :  { %v5053_v8 = vld [vmem:[#allocation5 + $0x3c4] ss:$28 sps:$4 sm:$0xff]   ;;  %v5056_v11 = vld [vmem:[#allocation5 + $0x3f4] ss:$28 sps:$4 sm:$0xff]   ;;  %v5059_v12 = vld [vmem:[#allocation5 + $0x3fc] ss:$28 sps:$4 sm:$0xff]  }
  0x75   :  { %v5051_v10 = vld [vmem:[#allocation5 + $0x3c0] ss:$28 sps:$4 sm:$0xff]   ;;  %v5054_v13 = vld [vmem:[#allocation5 + $0x3f0] ss:$28 sps:$4 sm:$0xff]   ;;  %v5057_v14 = vld [vmem:[#allocation5 + $0x3f8] ss:$28 sps:$4 sm:$0xff]  }
  0x76   :  { %1574 = vmatpush1.bf16.msra.mxu0 %v4984_v26  ;;  %1656 = vmatpush1.bf16.msra.mxu1 %v4985_v27  ;;  %v5062_v15 = vld [vmem:[#allocation5 + $0x42c] ss:$28 sps:$4 sm:$0xff]   ;;  %v5065_v16 = vld [vmem:[#allocation5 + $0x434] ss:$28 sps:$4 sm:$0xff]   ;;  %v5068_v19 = vld [vmem:[#allocation5 + $0x464] ss:$28 sps:$4 sm:$0xff]  }
  0x77   :  { %1575 = vmatprep.subr.bf16.mxu0 %v4986_v28  ;;  %1657 = vmatprep.subr.bf16.mxu1 %v4988_v29  ;;  %v5060_v17 = vld [vmem:[#allocation5 + $0x428] ss:$28 sps:$4 sm:$0xff]   ;;  %v5063_v18 = vld [vmem:[#allocation5 + $0x430] ss:$28 sps:$4 sm:$0xff]   ;;  %v5066_v21 = vld [vmem:[#allocation5 + $0x460] ss:$28 sps:$4 sm:$0xff]  }
  0x78   :  { %v5071_v20 = vld [vmem:[#allocation5 + $0x46c] ss:$28 sps:$4 sm:$0xff]   ;;  %v5074_v23 = vld [vmem:[#allocation5 + $0x49c] ss:$28 sps:$4 sm:$0xff]   ;;  %v5077_v24 = vld [vmem:[#allocation5 + $0x4a4] ss:$28 sps:$4 sm:$0xff]  }
  0x79   :  { %v5069_v22 = vld [vmem:[#allocation5 + $0x468] ss:$28 sps:$4 sm:$0xff]   ;;  %v5072_v25 = vld [vmem:[#allocation5 + $0x498] ss:$28 sps:$4 sm:$0xff]   ;;  %v5075_v26 = vld [vmem:[#allocation5 + $0x4a0] ss:$28 sps:$4 sm:$0xff]  }
  0x7a   :  { %1576 = vmatpush1.bf16.msra.mxu0 %v4990_v30  ;;  %1658 = vmatpush1.bf16.msra.mxu1 %v4991_v31  ;;  %v5080_v27 = vld [vmem:[#allocation5 + $0x4d4] ss:$28 sps:$4 sm:$0xff]   ;;  %v5083_v28 = vld [vmem:[#allocation5 + $0x4dc] ss:$28 sps:$4 sm:$0xff]  }
  0x7b   :  { %1577 = vmatprep.subr.bf16.mxu0 %v4992_v32  ;;  %1659 = vmatprep.subr.bf16.mxu1 %v4994_v33  ;;  %v5996_v29 = vld [vmem:[#allocation2 + $0x8] sm:$0xff]  ;;  %v5078_v31 = vld [vmem:[#allocation5 + $0x4d0] ss:$28 sps:$4 sm:$0xff]  }
  0x7c   :  { %v6000_v30 = vcombine.high %v5996_v29, %v5996_v29  ;;  %v5081_v32 = vld [vmem:[#allocation5 + $0x4d8] ss:$28 sps:$4 sm:$0xff]   ;;  %v5086_v33 = vld [vmem:[#allocation5 + $0x50c] ss:$28 sps:$4 sm:$0xff]  }
  0x7d   :  { %v5107_v46 = vld [vmem:[#allocation5 + $0x5bc] ss:$28 sps:$4 sm:$0xff]  }
  0x7e   :  { %1578 = vmatpush1.bf16.msra.mxu0 %v4996_v34  ;;  %1660 = vmatpush1.bf16.msra.mxu1 %v4997_v35  ;;  %v5089_v34 = vld [vmem:[#allocation5 + $0x514] ss:$28 sps:$4 sm:$0xff]   ;;  %v5084_v35 = vld [vmem:[#allocation5 + $0x508] ss:$28 sps:$4 sm:$0xff]  }
  0x7f   :  { %1579 = vmatprep.subr.bf16.mxu0 %v4998_v36  ;;  %1661 = vmatprep.subr.bf16.mxu1 %v5000_v37  ;;  %v5087_v36 = vld [vmem:[#allocation5 + $0x510] ss:$28 sps:$4 sm:$0xff]   ;;  %v5092_v37 = vld [vmem:[#allocation5 + $0x544] ss:$28 sps:$4 sm:$0xff]  }
  0x82   :  { %1580 = vmatpush1.bf16.msra.mxu0 %v5002_v38  ;;  %1662 = vmatpush1.bf16.msra.mxu1 %v5003_v39  ;;  %v5095_v38 = vld [vmem:[#allocation5 + $0x54c] ss:$28 sps:$4 sm:$0xff]   ;;  %v5090_v39 = vld [vmem:[#allocation5 + $0x540] ss:$28 sps:$4 sm:$0xff]  }
  0x83   :  { %1581 = vmatprep.subr.bf16.mxu0 %v5004_v40  ;;  %1663 = vmatprep.subr.bf16.mxu1 %v5006_v41  ;;  %v5093_v40 = vld [vmem:[#allocation5 + $0x548] ss:$28 sps:$4 sm:$0xff]   ;;  %v5098_v41 = vld [vmem:[#allocation5 + $0x57c] ss:$28 sps:$4 sm:$0xff]  }
  0x86   :  { %1582 = vmatpush1.bf16.msra.mxu0 %v5008_v42  ;;  %1664 = vmatpush1.bf16.msra.mxu1 %v5009_v43  ;;  %v5101_v42 = vld [vmem:[#allocation5 + $0x584] ss:$28 sps:$4 sm:$0xff]   ;;  %v5096_v43 = vld [vmem:[#allocation5 + $0x578] ss:$28 sps:$4 sm:$0xff]  }
  0x87   :  { %1583 = vmatprep.subr.bf16.mxu0 %v5010_v44  ;;  %1665 = vmatprep.subr.bf16.mxu1 %v5012_v45  ;;  %v5099_v44 = vld [vmem:[#allocation5 + $0x580] ss:$28 sps:$4 sm:$0xff]   ;;  %v5104_v45 = vld [vmem:[#allocation5 + $0x5b4] ss:$28 sps:$4 sm:$0xff]  }
  0x8a   :  { %1584 = vmatpush1.bf16.msra.mxu0 %v5014_v47  ;;  %1666 = vmatpush1.bf16.msra.mxu1 %v5015_v49  ;;  %v5102_v47 = vld [vmem:[#allocation5 + $0x5b0] ss:$28 sps:$4 sm:$0xff]   ;;  %v5105_v49 = vld [vmem:[#allocation5 + $0x5b8] ss:$28 sps:$4 sm:$0xff]  }
  0x8b   :  { %1585 = vmatprep.subr.bf16.mxu0 %v5016_v50  ;;  %1667 = vmatprep.subr.bf16.mxu1 %v5018_v51  ;;  %v5110_v50 = vld [vmem:[#allocation5 + $0x5ec] ss:$28 sps:$4 sm:$0xff]   ;;  %v5113_v51 = vld [vmem:[#allocation5 + $0x5f4] ss:$28 sps:$4 sm:$0xff]  }
  0x8e   :  { %1586 = vmatpush1.bf16.msra.mxu0 %v5020_v52  ;;  %1668 = vmatpush1.bf16.msra.mxu1 %v5021_v53  ;;  %v5108_v52 = vld [vmem:[#allocation5 + $0x5e8] ss:$28 sps:$4 sm:$0xff]   ;;  %v5111_v53 = vld [vmem:[#allocation5 + $0x5f0] ss:$28 sps:$4 sm:$0xff]  }
  0x8f   :  { %1587 = vmatprep.subr.bf16.mxu0 %v5022_v54  ;;  %1669 = vmatprep.subr.bf16.mxu1 %v5024_v55  ;;  %v5116_v54 = vld [vmem:[#allocation5 + $0x624] ss:$28 sps:$4 sm:$0xff]   ;;  %v5119_v55 = vld [vmem:[#allocation5 + $0x62c] ss:$28 sps:$4 sm:$0xff]  }
  0x92   :  { %1588 = vmatpush1.bf16.msra.mxu0 %v5026_v56  ;;  %1670 = vmatpush1.bf16.msra.mxu1 %v5027_v57  ;;  %v5114_v56 = vld [vmem:[#allocation5 + $0x620] ss:$28 sps:$4 sm:$0xff]   ;;  %v5117_v57 = vld [vmem:[#allocation5 + $0x628] ss:$28 sps:$4 sm:$0xff]  }
  0x93   :  { %1589 = vmatprep.subr.bf16.mxu0 %v5028_v58  ;;  %1671 = vmatprep.subr.bf16.mxu1 %v5030_v59  ;;  %v5122_v58 = vld [vmem:[#allocation5 + $0x65c] ss:$28 sps:$4 sm:$0xff]   ;;  %v5125_v59 = vld [vmem:[#allocation5 + $0x664] ss:$28 sps:$4 sm:$0xff]  }
  0x96   :  { %1590 = vmatpush1.bf16.msra.mxu0 %v5032_v60  ;;  %1672 = vmatpush1.bf16.msra.mxu1 %v5033_v61  ;;  %v5120_v60 = vld [vmem:[#allocation5 + $0x658] ss:$28 sps:$4 sm:$0xff]   ;;  %v5123_v61 = vld [vmem:[#allocation5 + $0x660] ss:$28 sps:$4 sm:$0xff]  }
  0x97   :  { %1591 = vmatprep.subr.bf16.mxu0 %v5034_v62  ;;  %1673 = vmatprep.subr.bf16.mxu1 %v5036_v63  ;;  %v5128_v62 = vld [vmem:[#allocation5 + $0x694] ss:$28 sps:$4 sm:$0xff]   ;;  %v5131_v63 = vld [vmem:[#allocation5 + $0x69c] ss:$28 sps:$4 sm:$0xff]  }
  0x9a   :  { %1592 = vmatpush1.bf16.msra.mxu0 %v5038_v0  ;;  %1674 = vmatpush1.bf16.msra.mxu1 %v5039_v1  ;;  %v5126_v0 = vld [vmem:[#allocation5 + $0x690] ss:$28 sps:$4 sm:$0xff]   ;;  %v5129_v1 = vld [vmem:[#allocation5 + $0x698] ss:$28 sps:$4 sm:$0xff]  }
  0x9b   :  { %1602 = vmatprep.subr.bf16.mxu0 %v5043_v2  ;;  %1684 = vmatprep.subr.bf16.mxu1 %v5046_v3  ;;  %v5134_v2 = vld [vmem:[#allocation5 + $0x6cc] ss:$28 sps:$4 sm:$0xff]   ;;  %v5137_v3 = vld [vmem:[#allocation5 + $0x6d4] ss:$28 sps:$4 sm:$0xff]  }
  0x9d   :  { %1594 = vmatmul.mubr.bf16.vlgmr.msra.gmra.mrb[0].mxu0 %v5992_v5  ;;  %1676 = vmatmul.mubr.bf16.vlgmr.msra.gmra.mrb[0].mxu1 %v5992_v5 }
  0x9e   :  { %1603 = vmatpush1.bf16.msra.mxu0 %v5041_v4  ;;  %1685 = vmatpush1.bf16.msra.mxu1 %v5044_v6  ;;  %v5132_v4 = vld [vmem:[#allocation5 + $0x6c8] ss:$28 sps:$4 sm:$0xff]   ;;  %v5135_v6 = vld [vmem:[#allocation5 + $0x6d0] ss:$28 sps:$4 sm:$0xff]  }
  0x9f   :  { %1604 = vmatprep.subr.bf16.mxu0 %v5050_v7  ;;  %1686 = vmatprep.subr.bf16.mxu1 %v5053_v8  ;;  %v5142_v7 = vld [vmem:[#allocation5 + $0x14] ss:$28 sps:$4 sm:$0xff]  }
  0xa0   :  { %1634 = vmatprep.mubr.bf16.mxu0 %v6000_v30  ;;  %1716 = vmatprep.mubr.bf16.mxu1 %v6000_v30  ;;  %v5188_v8 = vld [vmem:[#allocation5 + $0x1d8] ss:$28 sps:$4 sm:$0xff]  }
  0xa2   :  { %1605 = vmatpush1.bf16.msra.mxu0 %v5048_v9  ;;  %1687 = vmatpush1.bf16.msra.mxu1 %v5051_v10  ;;  %v6006_v9 = vcombine.low %v5996_v29, %v5996_v29  ;;  %v5140_v10 = vld [vmem:[#allocation5 + $0x10] ss:$28 sps:$4 sm:$0xff]   ;;  %v5155_v29 = vld [vmem:[#allocation5 + $0x128] ss:$28 sps:$4 sm:$0xff]  }
  0xa3   :  { %1606 = vmatprep.subr.bf16.mxu0 %v5056_v11  ;;  %1688 = vmatprep.subr.bf16.mxu1 %v5059_v12  ;;  %v5189_v11 = vld [vmem:[#allocation5 + $0x18] ss:$28 sps:$4 sm:$0xff]   ;;  %v5145_v12 = vld [vmem:[#allocation5 + $0x4c] ss:$28 sps:$4 sm:$0xff]  }
  0xa6   :  { %1607 = vmatpush1.bf16.msra.mxu0 %v5054_v13  ;;  %1689 = vmatpush1.bf16.msra.mxu1 %v5057_v14  ;;  %v5193_v13 = vld [vmem:[#allocation5 + $0x210] ss:$28 sps:$4 sm:$0xff]   ;;  %v5143_v14 = vld [vmem:[#allocation5 + $0x48] ss:$28 sps:$4 sm:$0xff]  }
  0xa7   :  { %1608 = vmatprep.subr.bf16.mxu0 %v5062_v15  ;;  %1690 = vmatprep.subr.bf16.mxu1 %v5065_v16  ;;  %v5194_v15 = vld [vmem:[#allocation5 + $0x50] ss:$28 sps:$4 sm:$0xff]   ;;  %v5148_v16 = vld [vmem:[#allocation5 + $0x84] ss:$28 sps:$4 sm:$0xff]  }
  0xaa   :  { %1609 = vmatpush1.bf16.msra.mxu0 %v5060_v17  ;;  %1691 = vmatpush1.bf16.msra.mxu1 %v5063_v18  ;;  %v5198_v17 = vld [vmem:[#allocation5 + $0x248] ss:$28 sps:$4 sm:$0xff]   ;;  %v5146_v18 = vld [vmem:[#allocation5 + $0x80] ss:$28 sps:$4 sm:$0xff]  }
  0xab   :  { %1610 = vmatprep.subr.bf16.mxu0 %v5068_v19  ;;  %1692 = vmatprep.subr.bf16.mxu1 %v5071_v20  ;;  %v5151_v19 = vld [vmem:[#allocation5 + $0xbc] ss:$28 sps:$4 sm:$0xff]   ;;  %v5199_v20 = vld [vmem:[#allocation5 + $0x88] ss:$28 sps:$4 sm:$0xff]  }
  0xae   :  { %1611 = vmatpush1.bf16.msra.mxu0 %v5066_v21  ;;  %1693 = vmatpush1.bf16.msra.mxu1 %v5069_v22  ;;  %v5203_v21 = vld [vmem:[#allocation5 + $0x280] ss:$28 sps:$4 sm:$0xff]   ;;  %v5149_v22 = vld [vmem:[#allocation5 + $0xb8] ss:$28 sps:$4 sm:$0xff]  }
  0xaf   :  { %1612 = vmatprep.subr.bf16.mxu0 %v5074_v23  ;;  %1694 = vmatprep.subr.bf16.mxu1 %v5077_v24  ;;  %v5154_v23 = vld [vmem:[#allocation5 + $0xf4] ss:$28 sps:$4 sm:$0xff]   ;;  %v5204_v24 = vld [vmem:[#allocation5 + $0xc0] ss:$28 sps:$4 sm:$0xff]  }
  0xb2   :  { %1613 = vmatpush1.bf16.msra.mxu0 %v5072_v25  ;;  %1695 = vmatpush1.bf16.msra.mxu1 %v5075_v26  ;;  %v5208_v25 = vld [vmem:[#allocation5 + $0x2b8] ss:$28 sps:$4 sm:$0xff]   ;;  %v5152_v26 = vld [vmem:[#allocation5 + $0xf0] ss:$28 sps:$4 sm:$0xff]  }
  0xb3   :  { %1614 = vmatprep.subr.bf16.mxu0 %v5080_v27  ;;  %1696 = vmatprep.subr.bf16.mxu1 %v5083_v28  ;;  %v5157_v27 = vld [vmem:[#allocation5 + $0x12c] ss:$28 sps:$4 sm:$0xff]  }
  0xb4   :  { %v5213_v28 = vld [vmem:[#allocation5 + $0x2f0] ss:$28 sps:$4 sm:$0xff]  }
  0xb6   :  { %1615 = vmatpush1.bf16.msra.mxu0 %v5078_v31  ;;  %1697 = vmatpush1.bf16.msra.mxu1 %v5081_v32  ;;  %v5160_v31 = vld [vmem:[#allocation5 + $0x164] ss:$28 sps:$4 sm:$0xff]   ;;  %v5214_v32 = vld [vmem:[#allocation5 + $0x130] ss:$28 sps:$4 sm:$0xff]  }
  0xb7   :  { %1616 = vmatprep.subr.bf16.mxu0 %v5086_v33  ;;  %1698 = vmatprep.subr.bf16.mxu1 %v5089_v34  ;;  %v5218_v33 = vld [vmem:[#allocation5 + $0x328] ss:$28 sps:$4 sm:$0xff]   ;;  %v5158_v34 = vld [vmem:[#allocation5 + $0x160] ss:$28 sps:$4 sm:$0xff]  }
  0xba   :  { %1617 = vmatpush1.bf16.msra.mxu0 %v5084_v35  ;;  %1699 = vmatpush1.bf16.msra.mxu1 %v5087_v36  ;;  %v5219_v35 = vld [vmem:[#allocation5 + $0x168] ss:$28 sps:$4 sm:$0xff]   ;;  %v5163_v36 = vld [vmem:[#allocation5 + $0x19c] ss:$28 sps:$4 sm:$0xff]  }
  0xbb   :  { %1618 = vmatprep.subr.bf16.mxu0 %v5092_v37  ;;  %1700 = vmatprep.subr.bf16.mxu1 %v5095_v38  ;;  %v5223_v37 = vld [vmem:[#allocation5 + $0x360] ss:$28 sps:$4 sm:$0xff]   ;;  %v5161_v38 = vld [vmem:[#allocation5 + $0x198] ss:$28 sps:$4 sm:$0xff]  }
  0xbe   :  { %1619 = vmatpush1.bf16.msra.mxu0 %v5090_v39  ;;  %1701 = vmatpush1.bf16.msra.mxu1 %v5093_v40  ;;  %v5166_v39 = vld [vmem:[#allocation5 + $0x1d4] ss:$28 sps:$4 sm:$0xff]   ;;  %v5224_v40 = vld [vmem:[#allocation5 + $0x1a0] ss:$28 sps:$4 sm:$0xff]  }
  0xbf   :  { %1620 = vmatprep.subr.bf16.mxu0 %v5098_v41  ;;  %1702 = vmatprep.subr.bf16.mxu1 %v5101_v42  ;;  %v5228_v41 = vld [vmem:[#allocation5 + $0x558] ss:$28 sps:$4 sm:$0xff]   ;;  %v5164_v42 = vld [vmem:[#allocation5 + $0x1d0] ss:$28 sps:$4 sm:$0xff]  }
  0xc2   :  { %1621 = vmatpush1.bf16.msra.mxu0 %v5096_v43  ;;  %1703 = vmatpush1.bf16.msra.mxu1 %v5099_v44  ;;  %v5229_v43 = vld [vmem:[#allocation5 + $0x398] ss:$28 sps:$4 sm:$0xff]   ;;  %v5169_v44 = vld [vmem:[#allocation5 + $0x20c] ss:$28 sps:$4 sm:$0xff]  }
  0xc3   :  { %1622 = vmatprep.subr.bf16.mxu0 %v5104_v45  ;;  %1704 = vmatprep.subr.bf16.mxu1 %v5107_v46  ;;  %v5233_v45 = vld [vmem:[#allocation5 + $0x590] ss:$28 sps:$4 sm:$0xff]   ;;  %v5167_v46 = vld [vmem:[#allocation5 + $0x208] ss:$28 sps:$4 sm:$0xff]  }
  0xc6   :  { %1623 = vmatpush1.bf16.msra.mxu0 %v5102_v47  ;;  %1705 = vmatpush1.bf16.msra.mxu1 %v5105_v49  ;;  %v5234_v47 = vld [vmem:[#allocation5 + $0x3d0] ss:$28 sps:$4 sm:$0xff]   ;;  %v5172_v49 = vld [vmem:[#allocation5 + $0x244] ss:$28 sps:$4 sm:$0xff]  }
  0xc7   :  { %1624 = vmatprep.subr.bf16.mxu0 %v5110_v50  ;;  %1706 = vmatprep.subr.bf16.mxu1 %v5113_v51  ;;  %v5238_v50 = vld [vmem:[#allocation5 + $0x5c8] ss:$28 sps:$4 sm:$0xff]   ;;  %v5170_v51 = vld [vmem:[#allocation5 + $0x240] ss:$28 sps:$4 sm:$0xff]  }
  0xca   :  { %1625 = vmatpush1.bf16.msra.mxu0 %v5108_v52  ;;  %1707 = vmatpush1.bf16.msra.mxu1 %v5111_v53  ;;  %v5239_v52 = vld [vmem:[#allocation5 + $0x408] ss:$28 sps:$4 sm:$0xff]   ;;  %v5175_v53 = vld [vmem:[#allocation5 + $0x27c] ss:$28 sps:$4 sm:$0xff]  }
  0xcb   :  { %1626 = vmatprep.subr.bf16.mxu0 %v5116_v54  ;;  %1708 = vmatprep.subr.bf16.mxu1 %v5119_v55  ;;  %v5243_v54 = vld [vmem:[#allocation5 + $0x600] ss:$28 sps:$4 sm:$0xff]   ;;  %v5173_v55 = vld [vmem:[#allocation5 + $0x278] ss:$28 sps:$4 sm:$0xff]  }
  0xce   :  { %1627 = vmatpush1.bf16.msra.mxu0 %v5114_v56  ;;  %1709 = vmatpush1.bf16.msra.mxu1 %v5117_v57  ;;  %v5244_v56 = vld [vmem:[#allocation5 + $0x440] ss:$28 sps:$4 sm:$0xff]   ;;  %v5178_v57 = vld [vmem:[#allocation5 + $0x2b4] ss:$28 sps:$4 sm:$0xff]  }
  0xcf   :  { %1628 = vmatprep.subr.bf16.mxu0 %v5122_v58  ;;  %1710 = vmatprep.subr.bf16.mxu1 %v5125_v59  ;;  %v5248_v58 = vld [vmem:[#allocation5 + $0x638] ss:$28 sps:$4 sm:$0xff]   ;;  %v5176_v59 = vld [vmem:[#allocation5 + $0x2b0] ss:$28 sps:$4 sm:$0xff]  }
  0xd2   :  { %1629 = vmatpush1.bf16.msra.mxu0 %v5120_v60  ;;  %1711 = vmatpush1.bf16.msra.mxu1 %v5123_v61  ;;  %v5249_v60 = vld [vmem:[#allocation5 + $0x478] ss:$28 sps:$4 sm:$0xff]   ;;  %v5181_v61 = vld [vmem:[#allocation5 + $0x2ec] ss:$28 sps:$4 sm:$0xff]  }
  0xd3   :  { %1630 = vmatprep.subr.bf16.mxu0 %v5128_v62  ;;  %1712 = vmatprep.subr.bf16.mxu1 %v5131_v63  ;;  %v5253_v62 = vld [vmem:[#allocation5 + $0x670] ss:$28 sps:$4 sm:$0xff]   ;;  %v5179_v63 = vld [vmem:[#allocation5 + $0x2e8] ss:$28 sps:$4 sm:$0xff]  }
  0xd6   :  { %1631 = vmatpush1.bf16.msra.mxu0 %v5126_v0  ;;  %1713 = vmatpush1.bf16.msra.mxu1 %v5129_v1  ;;  %v5254_v0 = vld [vmem:[#allocation5 + $0x4b0] ss:$28 sps:$4 sm:$0xff]   ;;  %v5184_v1 = vld [vmem:[#allocation5 + $0x324] ss:$28 sps:$4 sm:$0xff]  }
  0xd7   :  { %1632 = vmatprep.subr.bf16.mxu0 %v5134_v2  ;;  %1714 = vmatprep.subr.bf16.mxu1 %v5137_v3  ;;  %v5258_v2 = vld [vmem:[#allocation5 + $0x6a8] ss:$28 sps:$4 sm:$0xff]   ;;  %v5182_v3 = vld [vmem:[#allocation5 + $0x320] ss:$28 sps:$4 sm:$0xff]  }
  0xda   :  { %1633 = vmatpush1.bf16.msra.mxu0 %v5132_v4  ;;  %1715 = vmatpush1.bf16.msra.mxu1 %v5135_v6  ;;  %v5259_v4 = vld [vmem:[#allocation5 + $0x4e8] ss:$28 sps:$4 sm:$0xff]   ;;  %v5187_v6 = vld [vmem:[#allocation5 + $0x35c] ss:$28 sps:$4 sm:$0xff]  }
  0xdb   :  { %1725 = vmatprep.subr.bf16.mxu0 %v5142_v7  ;;  %4811 = vmatprep.subr.bf16.mxu1 %v5188_v8  ;;  %v5263_v7 = vld [vmem:[#allocation5 + $0x6e0] ss:$28 sps:$4 sm:$0xff]   ;;  %v5185_v8 = vld [vmem:[#allocation5 + $0x358] ss:$28 sps:$4 sm:$0xff]  }
  0xdd   :  { %1635 = vmatmul.mubr.bf16.vlgmr.msra.gmra.mrb[0].mxu0 %v6006_v9  ;;  %1717 = vmatmul.mubr.bf16.vlgmr.msra.gmra.mrb[0].mxu1 %v6006_v9 }
  0xde   :  { %1726 = vmatpush1.bf16.msra.mxu0 %v5140_v10  ;;  %4812 = vmatpush3.bf16.msra.mxu1 %v5189_v11  ;;  %v5264_v10 = vld [vmem:[#allocation5 + $0x520] ss:$28 sps:$4 sm:$0xff]   ;;  %v5192_v11 = vld [vmem:[#allocation5 + $0x394] ss:$28 sps:$4 sm:$0xff]  }
  0xdf   :  { %1727 = vmatprep.subr.bf16.mxu0 %v5145_v12  ;;  %1757 = vmatprep.mubr.bf16.mxu0 %v5988_v48  ;;  %v5270_v12 = vld [vmem:[#allocation7 + $0x4] ss:$16 sps:$4 sm:$0xff]  }
  0xe0   :  { %4813 = vmatprep.subr.bf16.mxu1 %v5193_v13  ;;  %1839 = vmatprep.mubr.bf16.mxu1 %v5988_v48  ;;  %v5209_v48 = vld [vmem:[#allocation5 + $0xf8] ss:$28 sps:$4 sm:$0xff]   ;;  %v5190_v13 = vld [vmem:[#allocation5 + $0x390] ss:$28 sps:$4 sm:$0xff]  }
  0xe2   :  { %1728 = vmatpush1.bf16.msra.mxu0 %v5143_v14  ;;  %4814 = vmatpush3.bf16.msra.mxu1 %v5194_v15  ;;  %v5197_v14 = vld [vmem:[#allocation5 + $0x3cc] ss:$28 sps:$4 sm:$0xff]   ;;  %v5268_v15 = vld [vmem:[#allocation7] ss:$16 sps:$4 sm:$0xff]  }
  0xe3   :  { %1729 = vmatprep.subr.bf16.mxu0 %v5148_v16  ;;  %4815 = vmatprep.subr.bf16.mxu1 %v5198_v17  ;;  %v5276_v16 = vld [vmem:[#allocation7 + $0x24] ss:$16 sps:$4 sm:$0xff]  }
  0xe4   :  { %v5195_v17 = vld [vmem:[#allocation5 + $0x3c8] ss:$28 sps:$4 sm:$0xff]  }
  0xe6   :  { %1730 = vmatpush1.bf16.msra.mxu0 %v5146_v18  ;;  %4816 = vmatpush3.bf16.msra.mxu1 %v5199_v20  ;;  %v5202_v18 = vld [vmem:[#allocation5 + $0x404] ss:$28 sps:$4 sm:$0xff]  }
  0xe7   :  { %1731 = vmatprep.subr.bf16.mxu0 %v5151_v19  ;;  %4817 = vmatprep.subr.bf16.mxu1 %v5203_v21  ;;  %v5274_v19 = vld [vmem:[#allocation7 + $0x20] ss:$16 sps:$4 sm:$0xff]   ;;  %v5282_v21 = vld [vmem:[#allocation7 + $0x44] ss:$16 sps:$4 sm:$0xff]  }
  0xe8   :  { %v5200_v20 = vld [vmem:[#allocation5 + $0x400] ss:$28 sps:$4 sm:$0xff]  }
  0xea   :  { %1732 = vmatpush1.bf16.msra.mxu0 %v5149_v22  ;;  %4818 = vmatpush3.bf16.msra.mxu1 %v5204_v24  ;;  %v5207_v22 = vld [vmem:[#allocation5 + $0x43c] ss:$28 sps:$4 sm:$0xff]   ;;  %v5288_v24 = vld [vmem:[#allocation7 + $0x64] ss:$16 sps:$4 sm:$0xff]  }
  0xeb   :  { %1733 = vmatprep.subr.bf16.mxu0 %v5154_v23  ;;  %4819 = vmatprep.subr.bf16.mxu1 %v5208_v25  ;;  %v5280_v23 = vld [vmem:[#allocation7 + $0x40] ss:$16 sps:$4 sm:$0xff]  }
  0xec   :  { %v5212_v25 = vld [vmem:[#allocation5 + $0x474] ss:$28 sps:$4 sm:$0xff]  }
  0xee   :  { %1734 = vmatpush1.bf16.msra.mxu0 %v5152_v26  ;;  %4820 = vmatpush3.bf16.msra.mxu1 %v5209_v48  ;;  %v5286_v26 = vld [vmem:[#allocation7 + $0x60] ss:$16 sps:$4 sm:$0xff]   ;;  %v5217_v48 = vld [vmem:[#allocation5 + $0x4ac] ss:$28 sps:$4 sm:$0xff]  }
  0xef   :  { %1735 = vmatprep.subr.bf16.mxu0 %v5157_v27  ;;  %4821 = vmatprep.subr.bf16.mxu1 %v5213_v28  ;;  %v5294_v27 = vld [vmem:[#allocation7 + $0x84] ss:$16 sps:$4 sm:$0xff]   ;;  %v5292_v28 = vld [vmem:[#allocation7 + $0x80] ss:$16 sps:$4 sm:$0xff]  }
  0xf2   :  { %1736 = vmatpush1.bf16.msra.mxu0 %v5155_v29  ;;  %4822 = vmatpush3.bf16.msra.mxu1 %v5214_v32  ;;  %v5300_v29 = vld [vmem:[#allocation7 + $0xa4] ss:$16 sps:$4 sm:$0xff]  }
  0xf3   :  { %1737 = vmatprep.subr.bf16.mxu0 %v5160_v31  ;;  %4823 = vmatprep.subr.bf16.mxu1 %v5218_v33  ;;  %v5215_v31 = vld [vmem:[#allocation5 + $0x4a8] ss:$28 sps:$4 sm:$0xff]   ;;  %v5298_v33 = vld [vmem:[#allocation7 + $0xa0] ss:$16 sps:$4 sm:$0xff]  }
  0xf4   :  { %v5222_v32 = vld [vmem:[#allocation5 + $0x4e4] ss:$28 sps:$4 sm:$0xff]  }
  0xf6   :  { %1738 = vmatpush1.bf16.msra.mxu0 %v5158_v34  ;;  %4824 = vmatpush3.bf16.msra.mxu1 %v5219_v35  ;;  %v5306_v34 = vld [vmem:[#allocation7 + $0xc4] ss:$16 sps:$4 sm:$0xff]   ;;  %v5220_v35 = vld [vmem:[#allocation5 + $0x4e0] ss:$28 sps:$4 sm:$0xff]  }
  0xf7   :  { %1739 = vmatprep.subr.bf16.mxu0 %v5163_v36  ;;  %4825 = vmatprep.subr.bf16.mxu1 %v5223_v37  ;;  %v5227_v36 = vld [vmem:[#allocation5 + $0x51c] ss:$28 sps:$4 sm:$0xff]   ;;  %v5304_v37 = vld [vmem:[#allocation7 + $0xc0] ss:$16 sps:$4 sm:$0xff]  }
  0xfa   :  { %1740 = vmatpush1.bf16.msra.mxu0 %v5161_v38  ;;  %4826 = vmatpush3.bf16.msra.mxu1 %v5224_v40  ;;  %v5312_v38 = vld [vmem:[#allocation7 + $0xe4] ss:$16 sps:$4 sm:$0xff]  }
  0xfb   :  { %1741 = vmatprep.subr.bf16.mxu0 %v5166_v39  ;;  %4833 = vmatprep.subr.bf16.mxu1 %v5228_v41  ;;  %v5225_v39 = vld [vmem:[#allocation5 + $0x518] ss:$28 sps:$4 sm:$0xff]   ;;  %v5310_v41 = vld [vmem:[#allocation7 + $0xe0] ss:$16 sps:$4 sm:$0xff]  }
  0xfc   :  { %v5232_v40 = vld [vmem:[#allocation5 + $0x554] ss:$28 sps:$4 sm:$0xff]  }
  0xfd   :  { %1840 = vmatmul.mubr.bf16.vlgmr.msra.gmra.mrb[4].mxu1 %v5992_v5 }
  0xfe   :  { %1742 = vmatpush1.bf16.msra.mxu0 %v5164_v42  ;;  %4834 = vmatpush3.bf16.msra.mxu1 %v5229_v43  ;;  %v5318_v42 = vld [vmem:[#allocation7 + $0x104] ss:$16 sps:$4 sm:$0xff]   ;;  %v5230_v43 = vld [vmem:[#allocation5 + $0x550] ss:$28 sps:$4 sm:$0xff]  }
  0xff   :  { %1743 = vmatprep.subr.bf16.mxu0 %v5169_v44  ;;  %4835 = vmatprep.subr.bf16.mxu1 %v5233_v45  ;;  %v5237_v44 = vld [vmem:[#allocation5 + $0x58c] ss:$28 sps:$4 sm:$0xff]   ;;  %v5316_v45 = vld [vmem:[#allocation7 + $0x100] ss:$16 sps:$4 sm:$0xff]  }
 0x100   :  { %1879 = vmatprep.mubr.bf16.mxu1 %v6000_v30 }
 0x102   :  { %1744 = vmatpush1.bf16.msra.mxu0 %v5167_v46  ;;  %4836 = vmatpush3.bf16.msra.mxu1 %v5234_v47  ;;  %v5324_v46 = vld [vmem:[#allocation7 + $0x124] ss:$16 sps:$4 sm:$0xff]  }
 0x103   :  { %1745 = vmatprep.subr.bf16.mxu0 %v5172_v49  ;;  %4837 = vmatprep.subr.bf16.mxu1 %v5238_v50  ;;  %v5235_v47 = vld [vmem:[#allocation5 + $0x588] ss:$28 sps:$4 sm:$0xff]   ;;  %v5322_v50 = vld [vmem:[#allocation7 + $0x120] ss:$16 sps:$4 sm:$0xff]  }
 0x104   :  { %v5242_v49 = vld [vmem:[#allocation5 + $0x5c4] ss:$28 sps:$4 sm:$0xff]  }
 0x106   :  { %1746 = vmatpush1.bf16.msra.mxu0 %v5170_v51  ;;  %4838 = vmatpush3.bf16.msra.mxu1 %v5239_v52  ;;  %v5330_v51 = vld [vmem:[#allocation7 + $0x144] ss:$16 sps:$4 sm:$0xff]   ;;  %v5240_v52 = vld [vmem:[#allocation5 + $0x5c0] ss:$28 sps:$4 sm:$0xff]  }
 0x107   :  { %1747 = vmatprep.subr.bf16.mxu0 %v5175_v53  ;;  %4839 = vmatprep.subr.bf16.mxu1 %v5243_v54  ;;  %v5247_v53 = vld [vmem:[#allocation5 + $0x5fc] ss:$28 sps:$4 sm:$0xff]   ;;  %v5328_v54 = vld [vmem:[#allocation7 + $0x140] ss:$16 sps:$4 sm:$0xff]  }
 0x10a   :  { %1748 = vmatpush1.bf16.msra.mxu0 %v5173_v55  ;;  %4840 = vmatpush3.bf16.msra.mxu1 %v5244_v56  ;;  %v5336_v55 = vld [vmem:[#allocation7 + $0x164] ss:$16 sps:$4 sm:$0xff]  }
 0x10b   :  { %1749 = vmatprep.subr.bf16.mxu0 %v5178_v57  ;;  %4841 = vmatprep.subr.bf16.mxu1 %v5248_v58  ;;  %v5245_v56 = vld [vmem:[#allocation5 + $0x5f8] ss:$28 sps:$4 sm:$0xff]   ;;  %v5334_v58 = vld [vmem:[#allocation7 + $0x160] ss:$16 sps:$4 sm:$0xff]  }
 0x10c   :  { %v5252_v57 = vld [vmem:[#allocation5 + $0x634] ss:$28 sps:$4 sm:$0xff]  }
 0x10e   :  { %1750 = vmatpush1.bf16.msra.mxu0 %v5176_v59  ;;  %4842 = vmatpush3.bf16.msra.mxu1 %v5249_v60  ;;  %v5342_v59 = vld [vmem:[#allocation7 + $0x184] ss:$16 sps:$4 sm:$0xff]   ;;  %v5250_v60 = vld [vmem:[#allocation5 + $0x630] ss:$28 sps:$4 sm:$0xff]  }
 0x10f   :  { %1751 = vmatprep.subr.bf16.mxu0 %v5181_v61  ;;  %4843 = vmatprep.subr.bf16.mxu1 %v5253_v62  ;;  %v5257_v61 = vld [vmem:[#allocation5 + $0x66c] ss:$28 sps:$4 sm:$0xff]   ;;  %v5340_v62 = vld [vmem:[#allocation7 + $0x180] ss:$16 sps:$4 sm:$0xff]  }
 0x112   :  { %1752 = vmatpush1.bf16.msra.mxu0 %v5179_v63  ;;  %4844 = vmatpush3.bf16.msra.mxu1 %v5254_v0  ;;  %v5348_v63 = vld [vmem:[#allocation7 + $0x1a4] ss:$16 sps:$4 sm:$0xff]  }
 0x113   :  { %1753 = vmatprep.subr.bf16.mxu0 %v5184_v1  ;;  %4845 = vmatprep.subr.bf16.mxu1 %v5258_v2  ;;  %v5255_v0 = vld [vmem:[#allocation5 + $0x668] ss:$28 sps:$4 sm:$0xff]   ;;  %v5346_v2 = vld [vmem:[#allocation7 + $0x1a0] ss:$16 sps:$4 sm:$0xff]  }
 0x114   :  { %v5262_v1 = vld [vmem:[#allocation5 + $0x6a4] ss:$28 sps:$4 sm:$0xff]  }
 0x116   :  { %1754 = vmatpush1.bf16.msra.mxu0 %v5182_v3  ;;  %4846 = vmatpush3.bf16.msra.mxu1 %v5259_v4  ;;  %v5354_v3 = vld [vmem:[#allocation7 + $0x1c4] ss:$16 sps:$4 sm:$0xff]   ;;  %v5260_v4 = vld [vmem:[#allocation5 + $0x6a0] ss:$28 sps:$4 sm:$0xff]  }
 0x117   :  { %1755 = vmatprep.subr.bf16.mxu0 %v5187_v6  ;;  %4847 = vmatprep.subr.bf16.mxu1 %v5263_v7  ;;  %v5267_v6 = vld [vmem:[#allocation5 + $0x6dc] ss:$28 sps:$4 sm:$0xff]   ;;  %v5352_v7 = vld [vmem:[#allocation7 + $0x1c0] ss:$16 sps:$4 sm:$0xff]  }
 0x11a   :  { %1756 = vmatpush1.bf16.msra.mxu0 %v5185_v8  ;;  %4848 = vmatpush3.bf16.msra.mxu1 %v5264_v10  ;;  %v5360_v8 = vld [vmem:[#allocation7 + $0x1e4] ss:$16 sps:$4 sm:$0xff]  }
 0x11b   :  { %1766 = vmatprep.subr.bf16.mxu0 %v5192_v11  ;;  %3267 = vmatprep.subr.bf16.mxu1 %v5270_v12  ;;  %v5265_v10 = vld [vmem:[#allocation5 + $0x6d8] ss:$28 sps:$4 sm:$0xff]   ;;  %v5273_v11 = vld [vmem:[#allocation7 + $0xc] ss:$16 sps:$4 sm:$0xff]   ;;  %v5358_v12 = vld [vmem:[#allocation7 + $0x1e0] ss:$16 sps:$4 sm:$0xff]  }
 0x11d   :  { %1758 = vmatmul.mubr.bf16.vlgmr.msra.gmra.mrb[4].mxu0 %v5992_v5  ;;  %1880 = vmatmul.mubr.bf16.vlgmr.msra.gmra.mrb[8].mxu1 %v6006_v9  ;;  %v5205_v5 = vld [vmem:[#allocation5 + $0x438] ss:$28 sps:$4 sm:$0xff]  }
 0x11e   :  { %1767 = vmatpush1.bf16.msra.mxu0 %v5190_v13  ;;  %1798 = vmatprep.mubr.bf16.mxu0 %v6000_v30  ;;  %v5210_v30 = vld [vmem:[#allocation5 + $0x470] ss:$28 sps:$4 sm:$0xff]   ;;  %v5366_v13 = vld [vmem:[#allocation7 + $0x204] ss:$16 sps:$4 sm:$0xff]  }
 0x11f   :  { %1768 = vmatprep.subr.bf16.mxu0 %v5197_v14  ;;  %3268 = vmatpush1.bf16.msra.mxu1 %v5268_v15  ;;  %v5271_v14 = vld [vmem:[#allocation7 + $0x8] ss:$16 sps:$4 sm:$0xff]   ;;  %v5279_v15 = vld [vmem:[#allocation7 + $0x2c] ss:$16 sps:$4 sm:$0xff]  }
 0x120   :  { %3269 = vmatprep.subr.bf16.mxu1 %v5276_v16  ;;  %v5277_v16 = vld [vmem:[#allocation7 + $0x28] ss:$16 sps:$4 sm:$0xff]  }
 0x122   :  { %1769 = vmatpush1.bf16.msra.mxu0 %v5195_v17  ;;  %v5285_v17 = vld [vmem:[#allocation7 + $0x4c] ss:$16 sps:$4 sm:$0xff]  }
 0x123   :  { %1770 = vmatprep.subr.bf16.mxu0 %v5202_v18  ;;  %3270 = vmatpush1.bf16.msra.mxu1 %v5274_v19  ;;  %v5283_v18 = vld [vmem:[#allocation7 + $0x48] ss:$16 sps:$4 sm:$0xff]   ;;  %v5291_v19 = vld [vmem:[#allocation7 + $0x6c] ss:$16 sps:$4 sm:$0xff]  }
 0x124   :  { %3271 = vmatprep.subr.bf16.mxu1 %v5282_v21  ;;  %v5297_v21 = vld [vmem:[#allocation7 + $0x8c] ss:$16 sps:$4 sm:$0xff]  }
 0x126   :  { %1771 = vmatpush1.bf16.msra.mxu0 %v5200_v20  ;;  %v5289_v20 = vld [vmem:[#allocation7 + $0x68] ss:$16 sps:$4 sm:$0xff]  }
 0x127   :  { %1772 = vmatprep.subr.bf16.mxu0 %v5207_v22  ;;  %3272 = vmatpush1.bf16.msra.mxu1 %v5280_v23  ;;  %v5295_v22 = vld [vmem:[#allocation7 + $0x88] ss:$16 sps:$4 sm:$0xff]   ;;  %v5303_v23 = vld [vmem:[#allocation7 + $0xac] ss:$16 sps:$4 sm:$0xff]  }
 0x128   :  { %3273 = vmatprep.subr.bf16.mxu1 %v5288_v24  ;;  %v5301_v24 = vld [vmem:[#allocation7 + $0xa8] ss:$16 sps:$4 sm:$0xff]  }
 0x12a   :  { %1773 = vmatpush1.bf16.msra.mxu0 %v5205_v5  ;;  %v5307_v5 = vld [vmem:[#allocation7 + $0xc8] ss:$16 sps:$4 sm:$0xff]  }
 0x12b   :  { %1774 = vmatprep.subr.bf16.mxu0 %v5212_v25  ;;  %3274 = vmatpush1.bf16.msra.mxu1 %v5286_v26  ;;  %v5315_v25 = vld [vmem:[#allocation7 + $0xec] ss:$16 sps:$4 sm:$0xff]   ;;  %v5313_v26 = vld [vmem:[#allocation7 + $0xe8] ss:$16 sps:$4 sm:$0xff]  }
 0x12c   :  { %3275 = vmatprep.subr.bf16.mxu1 %v5294_v27  ;;  %v5321_v27 = vld [vmem:[#allocation7 + $0x10c] ss:$16 sps:$4 sm:$0xff]  }
 0x12e   :  { %1775 = vmatpush1.bf16.msra.mxu0 %v5210_v30  ;;  %v5319_v30 = vld [vmem:[#allocation7 + $0x108] ss:$16 sps:$4 sm:$0xff]  }
 0x12f   :  { %1776 = vmatprep.subr.bf16.mxu0 %v5217_v48  ;;  %3276 = vmatpush1.bf16.msra.mxu1 %v5292_v28  ;;  %v5327_v48 = vld [vmem:[#allocation7 + $0x12c] ss:$16 sps:$4 sm:$0xff]   ;;  %v5325_v28 = vld [vmem:[#allocation7 + $0x128] ss:$16 sps:$4 sm:$0xff]  }
 0x130   :  { %3277 = vmatprep.subr.bf16.mxu1 %v5300_v29  ;;  %v5333_v29 = vld [vmem:[#allocation7 + $0x14c] ss:$16 sps:$4 sm:$0xff]  }
 0x132   :  { %1777 = vmatpush1.bf16.msra.mxu0 %v5215_v31  ;;  %v5331_v31 = vld [vmem:[#allocation7 + $0x148] ss:$16 sps:$4 sm:$0xff]  }
 0x133   :  { %1778 = vmatprep.subr.bf16.mxu0 %v5222_v32  ;;  %3278 = vmatpush1.bf16.msra.mxu1 %v5298_v33  ;;  %v5339_v32 = vld [vmem:[#allocation7 + $0x16c] ss:$16 sps:$4 sm:$0xff]   ;;  %v5337_v33 = vld [vmem:[#allocation7 + $0x168] ss:$16 sps:$4 sm:$0xff]  }
 0x134   :  { %3279 = vmatprep.subr.bf16.mxu1 %v5306_v34  ;;  %v5345_v34 = vld [vmem:[#allocation7 + $0x18c] ss:$16 sps:$4 sm:$0xff]  }
 0x136   :  { %1779 = vmatpush1.bf16.msra.mxu0 %v5220_v35  ;;  %v5343_v35 = vld [vmem:[#allocation7 + $0x188] ss:$16 sps:$4 sm:$0xff]  }
 0x137   :  { %1780 = vmatprep.subr.bf16.mxu0 %v5227_v36  ;;  %3280 = vmatpush1.bf16.msra.mxu1 %v5304_v37  ;;  %v5351_v36 = vld [vmem:[#allocation7 + $0x1ac] ss:$16 sps:$4 sm:$0xff]   ;;  %v5349_v37 = vld [vmem:[#allocation7 + $0x1a8] ss:$16 sps:$4 sm:$0xff]  }
 0x138   :  { %3281 = vmatprep.subr.bf16.mxu1 %v5312_v38  ;;  %v5357_v38 = vld [vmem:[#allocation7 + $0x1cc] ss:$16 sps:$4 sm:$0xff]  }
 0x13a   :  { %1781 = vmatpush1.bf16.msra.mxu0 %v5225_v39  ;;  %v5355_v39 = vld [vmem:[#allocation7 + $0x1c8] ss:$16 sps:$4 sm:$0xff]  }
 0x13b   :  { %1782 = vmatprep.subr.bf16.mxu0 %v5232_v40  ;;  %3282 = vmatpush1.bf16.msra.mxu1 %v5310_v41  ;;  %v5363_v40 = vld [vmem:[#allocation7 + $0x1ec] ss:$16 sps:$4 sm:$0xff]   ;;  %v5361_v41 = vld [vmem:[#allocation7 + $0x1e8] ss:$16 sps:$4 sm:$0xff]  }
 0x13c   :  { %3283 = vmatprep.subr.bf16.mxu1 %v5318_v42  ;;  %v5369_v42 = vld [vmem:[#allocation7 + $0x20c] ss:$16 sps:$4 sm:$0xff]  }
 0x13e   :  { %1783 = vmatpush1.bf16.msra.mxu0 %v5230_v43  ;;  %v360_v43 = vlaneseq }
 0x13f   :  { %1784 = vmatprep.subr.bf16.mxu0 %v5237_v44  ;;  %3284 = vmatpush1.bf16.msra.mxu1 %v5316_v45 }
 0x140   :  { %3285 = vmatprep.subr.bf16.mxu1 %v5324_v46  ;;  %v6018_v44 = vshrl.u32 %v360_v43, 7  ;;  %v6026_v46 = vld [vmem:[%s6098_s2] sm:$0xff]  ;;  %v5415_v43 = vld [vmem:[#allocation7 + $0x308] ss:$16 sps:$4 sm:$0xff]  }
 0x142   :  { %1785 = vmatpush1.bf16.msra.mxu0 %v5235_v47  ;;  %v6021_v45 = vsub.s32 0, %v6018_v44  ;;  %v6029_v47 = vsub.s32 1, %v6018_v44 }
 0x143   :  { %1786 = vmatprep.subr.bf16.mxu0 %v5242_v49  ;;  %3286 = vmatpush1.bf16.msra.mxu1 %v5322_v50  ;;  %v374_v49 = vsub.s32 3, %v6018_v44 }
 0x144   :  { %3287 = vmatprep.subr.bf16.mxu1 %v5330_v51  ;;  %v363_v50 = vrot.slane %v6026_v46, %v6021_v45  ;;  %v367_v51 = vrot.slane %v6026_v46, %v6029_v47 }
 0x146   :  { %1787 = vmatpush1.bf16.msra.mxu0 %v5240_v52  ;;  %v375_v52 = vrot.slane %v6026_v46, %v374_v49 }
 0x147   :  { %1788 = vmatprep.subr.bf16.mxu0 %v5247_v53  ;;  %3288 = vmatpush1.bf16.msra.mxu1 %v5328_v54 }
 0x148   :  { %3289 = vmatprep.subr.bf16.mxu1 %v5336_v55 }
 0x14a   :  { %1789 = vmatpush1.bf16.msra.mxu0 %v5245_v56 }
 0x14b   :  { %1790 = vmatprep.subr.bf16.mxu0 %v5252_v57  ;;  %3290 = vmatpush1.bf16.msra.mxu1 %v5334_v58 }
 0x14c   :  { %3291 = vmatprep.subr.bf16.mxu1 %v5342_v59 }
 0x14e   :  { %1791 = vmatpush1.bf16.msra.mxu0 %v5250_v60 }
 0x14f   :  { %1792 = vmatprep.subr.bf16.mxu0 %v5257_v61  ;;  %3292 = vmatpush1.bf16.msra.mxu1 %v5340_v62 }
 0x150   :  { %3293 = vmatprep.subr.bf16.mxu1 %v5348_v63 }
 0x152   :  { %1793 = vmatpush1.bf16.msra.mxu0 %v5255_v0 }
 0x153   :  { %1794 = vmatprep.subr.bf16.mxu0 %v5262_v1  ;;  %3294 = vmatpush1.bf16.msra.mxu1 %v5346_v2 }
 0x154   :  { %3295 = vmatprep.subr.bf16.mxu1 %v5354_v3 }
 0x156   :  { %1795 = vmatpush1.bf16.msra.mxu0 %v5260_v4  ;;  %v5364_v4 = vld [vmem:[#allocation7 + $0x200] ss:$16 sps:$4 sm:$0xff]  }
 0x157   :  { %1796 = vmatprep.subr.bf16.mxu0 %v5267_v6  ;;  %3296 = vmatpush1.bf16.msra.mxu1 %v5352_v7  ;;  %v5367_v6 = vld [vmem:[#allocation7 + $0x208] ss:$16 sps:$4 sm:$0xff]  }
 0x158   :  { %3297 = vmatprep.subr.bf16.mxu1 %v5360_v8  ;;  %v5372_v8 = vld [vmem:[#allocation7 + $0x224] ss:$16 sps:$4 sm:$0xff]  }
 0x15a   :  { %1797 = vmatpush1.bf16.msra.mxu0 %v5265_v10  ;;  %v5375_v10 = vld [vmem:[#allocation7 + $0x22c] ss:$16 sps:$4 sm:$0xff]  }
 0x15b   :  { %3431 = vmatprep.subr.bf16.mxu0 %v5273_v11  ;;  %3298 = vmatpush1.bf16.msra.mxu1 %v5358_v12  ;;  %v5370_v12 = vld [vmem:[#allocation7 + $0x220] ss:$16 sps:$4 sm:$0xff]  }
 0x15c   :  { %3308 = vmatprep.subr.bf16.mxu1 %v5366_v13  ;;  %v5373_v13 = vld [vmem:[#allocation7 + $0x228] ss:$16 sps:$4 sm:$0xff]  }
 0x15d   :  { %1799 = vmatmul.mubr.bf16.vlgmr.msra.gmra.mrb[4].mxu0 %v6006_v9  ;;  %v5309_v9 = vld [vmem:[#allocation7 + $0xcc] ss:$16 sps:$4 sm:$0xff]  }
 0x15e   :  { %3432 = vmatpush1.bf16.msra.mxu0 %v5271_v14  ;;  %v5378_v14 = vld [vmem:[#allocation7 + $0x244] ss:$16 sps:$4 sm:$0xff]  }
 0x15f   :  { %3433 = vmatprep.subr.bf16.mxu0 %v5279_v15  ;;  %v5381_v15 = vld [vmem:[#allocation7 + $0x24c] ss:$16 sps:$4 sm:$0xff]  }
 0x162   :  { %3434 = vmatpush1.bf16.msra.mxu0 %v5277_v16  ;;  %v5376_v16 = vld [vmem:[#allocation7 + $0x240] ss:$16 sps:$4 sm:$0xff]  }
 0x163   :  { %3435 = vmatprep.subr.bf16.mxu0 %v5285_v17  ;;  %v5379_v17 = vld [vmem:[#allocation7 + $0x248] ss:$16 sps:$4 sm:$0xff]  }
 0x166   :  { %3436 = vmatpush1.bf16.msra.mxu0 %v5283_v18  ;;  %v5384_v18 = vld [vmem:[#allocation7 + $0x264] ss:$16 sps:$4 sm:$0xff]  }
 0x167   :  { %3437 = vmatprep.subr.bf16.mxu0 %v5291_v19  ;;  %v5387_v19 = vld [vmem:[#allocation7 + $0x26c] ss:$16 sps:$4 sm:$0xff]  }
 0x16a   :  { %3438 = vmatpush1.bf16.msra.mxu0 %v5289_v20  ;;  %v5382_v20 = vld [vmem:[#allocation7 + $0x260] ss:$16 sps:$4 sm:$0xff]  }
 0x16b   :  { %3439 = vmatprep.subr.bf16.mxu0 %v5297_v21  ;;  %v5385_v21 = vld [vmem:[#allocation7 + $0x268] ss:$16 sps:$4 sm:$0xff]  }
 0x16e   :  { %3440 = vmatpush1.bf16.msra.mxu0 %v5295_v22  ;;  %v5390_v22 = vld [vmem:[#allocation7 + $0x284] ss:$16 sps:$4 sm:$0xff]  }
 0x16f   :  { %3441 = vmatprep.subr.bf16.mxu0 %v5303_v23  ;;  %v5393_v23 = vld [vmem:[#allocation7 + $0x28c] ss:$16 sps:$4 sm:$0xff]  }
 0x172   :  { %3442 = vmatpush1.bf16.msra.mxu0 %v5301_v24  ;;  %v5388_v24 = vld [vmem:[#allocation7 + $0x280] ss:$16 sps:$4 sm:$0xff]  }
 0x173   :  { %3443 = vmatprep.subr.bf16.mxu0 %v5309_v9  ;;  %v5391_v9 = vld [vmem:[#allocation7 + $0x288] ss:$16 sps:$4 sm:$0xff]  }
 0x176   :  { %3444 = vmatpush1.bf16.msra.mxu0 %v5307_v5  ;;  %v5396_v5 = vld [vmem:[#allocation7 + $0x2a4] ss:$16 sps:$4 sm:$0xff]  }
 0x177   :  { %3445 = vmatprep.subr.bf16.mxu0 %v5315_v25  ;;  %v5399_v25 = vld [vmem:[#allocation7 + $0x2ac] ss:$16 sps:$4 sm:$0xff]  }
 0x17a   :  { %3446 = vmatpush1.bf16.msra.mxu0 %v5313_v26  ;;  %v5394_v26 = vld [vmem:[#allocation7 + $0x2a0] ss:$16 sps:$4 sm:$0xff]  }
 0x17b   :  { %3447 = vmatprep.subr.bf16.mxu0 %v5321_v27  ;;  %v5397_v27 = vld [vmem:[#allocation7 + $0x2a8] ss:$16 sps:$4 sm:$0xff]  }
 0x17e   :  { %3448 = vmatpush1.bf16.msra.mxu0 %v5319_v30  ;;  %v5402_v30 = vld [vmem:[#allocation7 + $0x2c4] ss:$16 sps:$4 sm:$0xff]  }
 0x17f   :  { %3449 = vmatprep.subr.bf16.mxu0 %v5327_v48  ;;  %v5405_v48 = vld [vmem:[#allocation7 + $0x2cc] ss:$16 sps:$4 sm:$0xff]  }
 0x182   :  { %3450 = vmatpush1.bf16.msra.mxu0 %v5325_v28  ;;  %v5400_v28 = vld [vmem:[#allocation7 + $0x2c0] ss:$16 sps:$4 sm:$0xff]  }
 0x183   :  { %3451 = vmatprep.subr.bf16.mxu0 %v5333_v29  ;;  %v5403_v29 = vld [vmem:[#allocation7 + $0x2c8] ss:$16 sps:$4 sm:$0xff]  }
 0x186   :  { %3452 = vmatpush1.bf16.msra.mxu0 %v5331_v31  ;;  %v5408_v31 = vld [vmem:[#allocation7 + $0x2e4] ss:$16 sps:$4 sm:$0xff]  }
 0x187   :  { %3453 = vmatprep.subr.bf16.mxu0 %v5339_v32  ;;  %v5411_v32 = vld [vmem:[#allocation7 + $0x2ec] ss:$16 sps:$4 sm:$0xff]  }
 0x18a   :  { %3454 = vmatpush1.bf16.msra.mxu0 %v5337_v33 }
 0x18b   :  { %3455 = vmatprep.subr.bf16.mxu0 %v5345_v34 }
 0x18e   :  { %3456 = vmatpush1.bf16.msra.mxu0 %v5343_v35  ;;  %v5406_v35 = vld [vmem:[#allocation7 + $0x2e0] ss:$16 sps:$4 sm:$0xff]  }
 0x18f   :  { %3457 = vmatprep.subr.bf16.mxu0 %v5351_v36  ;;  %v5409_v36 = vld [vmem:[#allocation7 + $0x2e8] ss:$16 sps:$4 sm:$0xff]  }
 0x192   :  { %3458 = vmatpush1.bf16.msra.mxu0 %v5349_v37 }
 0x193   :  { %3459 = vmatprep.subr.bf16.mxu0 %v5357_v38 }
 0x196   :  { %3460 = vmatpush1.bf16.msra.mxu0 %v5355_v39  ;;  %v5414_v39 = vld [vmem:[#allocation7 + $0x304] ss:$16 sps:$4 sm:$0xff]  }
 0x197   :  { %3461 = vmatprep.subr.bf16.mxu0 %v5363_v40  ;;  %v5417_v40 = vld [vmem:[#allocation7 + $0x30c] ss:$16 sps:$4 sm:$0xff]  }
 0x19a   :  { %3462 = vmatpush1.bf16.msra.mxu0 %v5361_v41 }
 0x19b   :  { %3472 = vmatprep.subr.bf16.mxu0 %v5369_v42  ;;  %v5412_v42 = vld [vmem:[#allocation7 + $0x300] ss:$16 sps:$4 sm:$0xff]  }
 0x1b0   :  { %v1636_v53 = vpop.f32.mrb[0].mxu0  ;;  %v6039_v54 = vpop.f32.mrb[0].mxu1 }
 0x1b1   :  { %v4877_v55 = vadd.f32 %v1636_v53, %v363_v50  ;;  %v1638_v56 = vpop.f32.mrb[1].mxu0  ;;  %v1720_v57 = vpop.f32.mrb[1].mxu1  ;;  %v5420_v50 = vld [vmem:[#allocation7 + $0x324] ss:$16 sps:$4 sm:$0xff]   ;;  %v5421_v53 = vld [vmem:[#allocation7 + $0x328] ss:$16 sps:$4 sm:$0xff]  }
 0x1b2   :  { %v4878_v58 = vadd.f32 %v1638_v56, %v367_v51  ;;  %v4880_v59 = vadd.f32 %v1720_v57, %v375_v52  ;;  %v1640_v60 = vpop.f32.mrb[2].mxu0  ;;  %v1722_v61 = vpop.f32.mrb[2].mxu1  ;;  %v5423_v51 = vld [vmem:[#allocation7 + $0x32c] ss:$16 sps:$4 sm:$0xff]   ;;  %v5418_v52 = vld [vmem:[#allocation7 + $0x320] ss:$16 sps:$4 sm:$0xff]  }
 0x1b3   :  { %v1887_v62 = vmax.f32 %v4877_v55, 0.0  ;;  %v1641_v63 = vpop.f32.mrb[3].mxu0  ;;  %v1723_v0 = vpop.f32.mrb[3].mxu1  ;;  %v5426_v55 = vld [vmem:[#allocation7 + $0x344] ss:$16 sps:$4 sm:$0xff]  }
 0x1b4   :  { %v1888_v1 = vmax.f32 %v4878_v58, 0.0  ;;  %v1890_v2 = vmax.f32 %v4880_v59, 0.0  ;;  %v5429_v56 = vld [vmem:[#allocation7 + $0x34c] ss:$16 sps:$4 sm:$0xff]   ;;  %v5424_v57 = vld [vmem:[#allocation7 + $0x340] ss:$16 sps:$4 sm:$0xff]  }
 0x1b5   :  { %v1894_v7 = vpack.c.bf16 %v1887_v62, %v1887_v62  ;;  %v5427_v58 = vld [vmem:[#allocation7 + $0x348] ss:$16 sps:$4 sm:$0xff]   ;;  %v5432_v59 = vld [vmem:[#allocation7 + $0x364] ss:$16 sps:$4 sm:$0xff]   ;;  %v5435_v60 = vld [vmem:[#allocation7 + $0x36c] ss:$16 sps:$4 sm:$0xff]  }
 0x1b6   :  { %v1895_v3 = vpack.c.bf16 %v1888_v1, %v1888_v1  ;;  %v1897_v11 = vpack.c.bf16 %v1890_v2, %v1890_v2  ;;  %v5430_v61 = vld [vmem:[#allocation7 + $0x360] ss:$16 sps:$4 sm:$0xff]   ;;  %v5433_v62 = vld [vmem:[#allocation7 + $0x368] ss:$16 sps:$4 sm:$0xff]   ;;  %v5438_v63 = vld [vmem:[#allocation7 + $0x384] ss:$16 sps:$4 sm:$0xff]  }
 0x1b7   :  { %v5441_v0 = vld [vmem:[#allocation7 + $0x38c] ss:$16 sps:$4 sm:$0xff]   ;;  %v5436_v1 = vld [vmem:[#allocation7 + $0x380] ss:$16 sps:$4 sm:$0xff]   ;;  %v5439_v2 = vld [vmem:[#allocation7 + $0x388] ss:$16 sps:$4 sm:$0xff]  }
 0x1b8   :  { %3299 = vmatprep.mubr.bf16.mxu1 %v1895_v3  ;;  %3463 = vmatprep.mubr.bf16.mxu0 %v1895_v3  ;;  %v370_v3 = vsub.s32 2, %v6018_v44 }
 0x1b9   :  { %3300 = vmatmul.mubr.bf16.vlgmr.msra.gmra.mrb[12].mxu1 %v1894_v7  ;;  %3464 = vmatmul.mubr.bf16.vlgmr.msra.gmra.mrb[8].mxu0 %v1894_v7  ;;  %v386_v7 = vsub.s32 6, %v6018_v44 }
 0x1ba   :  { %3309 = vmatpush1.bf16.msra.mxu1 %v5364_v4  ;;  %3473 = vmatpush1.bf16.msra.mxu0 %v5367_v6  ;;  %v5444_v4 = vld [vmem:[#allocation7 + $0x3a4] ss:$16 sps:$4 sm:$0xff]   ;;  %v5447_v6 = vld [vmem:[#allocation7 + $0x3ac] ss:$16 sps:$4 sm:$0xff]  }
 0x1bb   :  { %3340 = vmatprep.mubr.bf16.mxu1 %v1897_v11  ;;  %3504 = vmatprep.mubr.bf16.mxu0 %v1897_v11  ;;  %v371_v11 = vrot.slane %v6026_v46, %v370_v3 }
 0x1bc   :  { %3310 = vmatprep.subr.bf16.mxu1 %v5372_v8  ;;  %3474 = vmatprep.subr.bf16.mxu0 %v5375_v10  ;;  %v5442_v8 = vld [vmem:[#allocation7 + $0x3a0] ss:$16 sps:$4 sm:$0xff]   ;;  %v5445_v10 = vld [vmem:[#allocation7 + $0x3a8] ss:$16 sps:$4 sm:$0xff]  }
 0x1be   :  { %3311 = vmatpush1.bf16.msra.mxu1 %v5370_v12  ;;  %3475 = vmatpush1.bf16.msra.mxu0 %v5373_v13  ;;  %v5450_v12 = vld [vmem:[#allocation7 + $0x3c4] ss:$16 sps:$4 sm:$0xff]   ;;  %v5453_v13 = vld [vmem:[#allocation7 + $0x3cc] ss:$16 sps:$4 sm:$0xff]  }
 0x1bf   :  { %3312 = vmatprep.subr.bf16.mxu1 %v5378_v14  ;;  %3476 = vmatprep.subr.bf16.mxu0 %v5381_v15  ;;  %v387_v14 = vrot.slane %v6026_v46, %v386_v7  ;;  %v5448_v15 = vld [vmem:[#allocation7 + $0x3c0] ss:$16 sps:$4 sm:$0xff]   ;;  %v5511_v7 = vld [vmem:[#allocation7 + $0x508] ss:$16 sps:$4 sm:$0xff]  }
 0x1c2   :  { %3313 = vmatpush1.bf16.msra.mxu1 %v5376_v16  ;;  %3477 = vmatpush1.bf16.msra.mxu0 %v5379_v17  ;;  %v5451_v16 = vld [vmem:[#allocation7 + $0x3c8] ss:$16 sps:$4 sm:$0xff]   ;;  %v4879_v17 = vadd.f32 %v6039_v54, %v371_v11  ;;  %v5514_v11 = vld [vmem:[#allocation7 + $0x520] ss:$16 sps:$4 sm:$0xff]  }
 0x1c3   :  { %3314 = vmatprep.subr.bf16.mxu1 %v5384_v18  ;;  %3478 = vmatprep.subr.bf16.mxu0 %v5387_v19  ;;  %v5456_v18 = vld [vmem:[#allocation7 + $0x3e4] ss:$16 sps:$4 sm:$0xff]   ;;  %v5459_v19 = vld [vmem:[#allocation7 + $0x3ec] ss:$16 sps:$4 sm:$0xff]  }
 0x1c6   :  { %3315 = vmatpush1.bf16.msra.mxu1 %v5382_v20  ;;  %3479 = vmatpush1.bf16.msra.mxu0 %v5385_v21 }
 0x1c7   :  { %3316 = vmatprep.subr.bf16.mxu1 %v5390_v22  ;;  %3480 = vmatprep.subr.bf16.mxu0 %v5393_v23  ;;  %v5454_v23 = vld [vmem:[#allocation7 + $0x3e0] ss:$16 sps:$4 sm:$0xff]  }
 0x1ca   :  { %3317 = vmatpush1.bf16.msra.mxu1 %v5388_v24  ;;  %3481 = vmatpush1.bf16.msra.mxu0 %v5391_v9  ;;  %v5457_v24 = vld [vmem:[#allocation7 + $0x3e8] ss:$16 sps:$4 sm:$0xff]  }
 0x1cb   :  { %3318 = vmatprep.subr.bf16.mxu1 %v5396_v5  ;;  %3482 = vmatprep.subr.bf16.mxu0 %v5399_v25  ;;  %v1889_v25 = vmax.f32 %v4879_v17, 0.0  ;;  %v5528_v17 = vld [vmem:[#allocation7 + $0x564] ss:$16 sps:$4 sm:$0xff]  }
 0x1ce   :  { %3319 = vmatpush1.bf16.msra.mxu1 %v5394_v26  ;;  %3483 = vmatpush1.bf16.msra.mxu0 %v5397_v27  ;;  %v5462_v26 = vld [vmem:[#allocation7 + $0x404] ss:$16 sps:$4 sm:$0xff]   ;;  %v5465_v27 = vld [vmem:[#allocation7 + $0x40c] ss:$16 sps:$4 sm:$0xff]  }
 0x1cf   :  { %3320 = vmatprep.subr.bf16.mxu1 %v5402_v30  ;;  %3484 = vmatprep.subr.bf16.mxu0 %v5405_v48  ;;  %v5460_v48 = vld [vmem:[#allocation7 + $0x400] ss:$16 sps:$4 sm:$0xff]  }
 0x1d0   :  { %v4827_v33 = vpop.f32.mrb[4].mxu1 }
 0x1d1   :  { %v4828_v34 = vpop.f32.mrb[5].mxu1 }
 0x1d2   :  { %3321 = vmatpush1.bf16.msra.mxu1 %v5400_v28  ;;  %3485 = vmatpush1.bf16.msra.mxu0 %v5403_v29  ;;  %v6041_v37 = vadd.f32 %v4828_v34, %v4827_v33  ;;  %v4830_v38 = vpop.f32.mrb[6].mxu1  ;;  %v5463_v28 = vld [vmem:[#allocation7 + $0x408] ss:$16 sps:$4 sm:$0xff]   ;;  %v1896_v29 = vpack.c.bf16 %v1889_v25, %v1889_v25  ;;  %v5466_v33 = vld [vmem:[#allocation7 + $0x420] ss:$16 sps:$4 sm:$0xff]   ;;  %v378_v25 = vsub.s32 4, %v6018_v44 }
 0x1d3   :  { %3322 = vmatprep.subr.bf16.mxu1 %v5408_v31  ;;  %3486 = vmatprep.subr.bf16.mxu0 %v5411_v32  ;;  %v4831_v41 = vpop.f32.mrb[7].mxu1  ;;  %v5468_v31 = vld [vmem:[#allocation7 + $0x424] ss:$16 sps:$4 sm:$0xff]   ;;  %v5471_v32 = vld [vmem:[#allocation7 + $0x42c] ss:$16 sps:$4 sm:$0xff]  }
 0x1d4   :  { %v1842_v20 = vadd.f32 %v6041_v37, %v387_v14  ;;  %v5469_v34 = vld [vmem:[#allocation7 + $0x428] ss:$16 sps:$4 sm:$0xff]   ;;  %v5472_v37 = vld [vmem:[#allocation7 + $0x440] ss:$16 sps:$4 sm:$0xff]   ;;  %v5525_v14 = vld [vmem:[#allocation7 + $0x54c] ss:$16 sps:$4 sm:$0xff]  }
 0x1d5   :  { %v5475_v38 = vld [vmem:[#allocation7 + $0x448] ss:$16 sps:$4 sm:$0xff]   ;;  %v5478_v41 = vld [vmem:[#allocation7 + $0x460] ss:$16 sps:$4 sm:$0xff]  }
 0x1d6   :  { %3323 = vmatpush1.bf16.msra.mxu1 %v5406_v35  ;;  %3487 = vmatpush1.bf16.msra.mxu0 %v5409_v36  ;;  %v5474_v35 = vld [vmem:[#allocation7 + $0x444] ss:$16 sps:$4 sm:$0xff]   ;;  %v5477_v36 = vld [vmem:[#allocation7 + $0x44c] ss:$16 sps:$4 sm:$0xff]  }
 0x1d7   :  { %3324 = vmatprep.subr.bf16.mxu1 %v5414_v39  ;;  %3488 = vmatprep.subr.bf16.mxu0 %v5417_v40  ;;  %v5480_v39 = vld [vmem:[#allocation7 + $0x464] ss:$16 sps:$4 sm:$0xff]   ;;  %v5483_v40 = vld [vmem:[#allocation7 + $0x46c] ss:$16 sps:$4 sm:$0xff]  }
 0x1da   :  { %3325 = vmatpush1.bf16.msra.mxu1 %v5412_v42  ;;  %3489 = vmatpush1.bf16.msra.mxu0 %v5415_v43  ;;  %v5481_v42 = vld [vmem:[#allocation7 + $0x468] ss:$16 sps:$4 sm:$0xff]   ;;  %v5486_v43 = vld [vmem:[#allocation7 + $0x484] ss:$16 sps:$4 sm:$0xff]  }
 0x1db   :  { %3326 = vmatprep.subr.bf16.mxu1 %v5420_v50  ;;  %3490 = vmatprep.subr.bf16.mxu0 %v5423_v51  ;;  %v5489_v50 = vld [vmem:[#allocation7 + $0x48c] ss:$16 sps:$4 sm:$0xff]   ;;  %v5484_v51 = vld [vmem:[#allocation7 + $0x480] ss:$16 sps:$4 sm:$0xff]  }
 0x1de   :  { %3327 = vmatpush1.bf16.msra.mxu1 %v5418_v52  ;;  %3491 = vmatpush1.bf16.msra.mxu0 %v5421_v53  ;;  %v5487_v52 = vld [vmem:[#allocation7 + $0x488] ss:$16 sps:$4 sm:$0xff]   ;;  %v5492_v53 = vld [vmem:[#allocation7 + $0x4a4] ss:$16 sps:$4 sm:$0xff]  }
 0x1df   :  { %3328 = vmatprep.subr.bf16.mxu1 %v5426_v55  ;;  %3492 = vmatprep.subr.bf16.mxu0 %v5429_v56  ;;  %v5495_v55 = vld [vmem:[#allocation7 + $0x4ac] ss:$16 sps:$4 sm:$0xff]   ;;  %v5490_v56 = vld [vmem:[#allocation7 + $0x4a0] ss:$16 sps:$4 sm:$0xff]  }
 0x1e2   :  { %3329 = vmatpush1.bf16.msra.mxu1 %v5424_v57  ;;  %3493 = vmatpush1.bf16.msra.mxu0 %v5427_v58  ;;  %v5493_v57 = vld [vmem:[#allocation7 + $0x4a8] ss:$16 sps:$4 sm:$0xff]   ;;  %v5498_v58 = vld [vmem:[#allocation7 + $0x4c4] ss:$16 sps:$4 sm:$0xff]  }
 0x1e3   :  { %3330 = vmatprep.subr.bf16.mxu1 %v5432_v59  ;;  %3494 = vmatprep.subr.bf16.mxu0 %v5435_v60  ;;  %v5501_v59 = vld [vmem:[#allocation7 + $0x4cc] ss:$16 sps:$4 sm:$0xff]   ;;  %v5496_v60 = vld [vmem:[#allocation7 + $0x4c0] ss:$16 sps:$4 sm:$0xff]  }
 0x1e6   :  { %3331 = vmatpush1.bf16.msra.mxu1 %v5430_v61  ;;  %3495 = vmatpush1.bf16.msra.mxu0 %v5433_v62  ;;  %v5499_v61 = vld [vmem:[#allocation7 + $0x4c8] ss:$16 sps:$4 sm:$0xff]   ;;  %v5504_v62 = vld [vmem:[#allocation7 + $0x4e4] ss:$16 sps:$4 sm:$0xff]  }
 0x1e7   :  { %3332 = vmatprep.subr.bf16.mxu1 %v5438_v63  ;;  %3496 = vmatprep.subr.bf16.mxu0 %v5441_v0  ;;  %v5507_v63 = vld [vmem:[#allocation7 + $0x4ec] ss:$16 sps:$4 sm:$0xff]   ;;  %v5502_v0 = vld [vmem:[#allocation7 + $0x4e0] ss:$16 sps:$4 sm:$0xff]  }
 0x1ea   :  { %3333 = vmatpush1.bf16.msra.mxu1 %v5436_v1  ;;  %3497 = vmatpush1.bf16.msra.mxu0 %v5439_v2  ;;  %v5505_v1 = vld [vmem:[#allocation7 + $0x4e8] ss:$16 sps:$4 sm:$0xff]   ;;  %v5510_v2 = vld [vmem:[#allocation7 + $0x504] ss:$16 sps:$4 sm:$0xff]  }
 0x1eb   :  { %3334 = vmatprep.subr.bf16.mxu1 %v5444_v4  ;;  %3498 = vmatprep.subr.bf16.mxu0 %v5447_v6  ;;  %v5513_v4 = vld [vmem:[#allocation7 + $0x50c] ss:$16 sps:$4 sm:$0xff]   ;;  %v5508_v6 = vld [vmem:[#allocation7 + $0x500] ss:$16 sps:$4 sm:$0xff]  }
 0x1ee   :  { %3335 = vmatpush1.bf16.msra.mxu1 %v5442_v8  ;;  %3499 = vmatpush1.bf16.msra.mxu0 %v5445_v10  ;;  %v5516_v8 = vld [vmem:[#allocation7 + $0x524] ss:$16 sps:$4 sm:$0xff]   ;;  %v5519_v10 = vld [vmem:[#allocation7 + $0x52c] ss:$16 sps:$4 sm:$0xff]  }
 0x1ef   :  { %3336 = vmatprep.subr.bf16.mxu1 %v5450_v12  ;;  %3500 = vmatprep.subr.bf16.mxu0 %v5453_v13  ;;  %v5517_v12 = vld [vmem:[#allocation7 + $0x528] ss:$16 sps:$4 sm:$0xff]   ;;  %v5522_v13 = vld [vmem:[#allocation7 + $0x544] ss:$16 sps:$4 sm:$0xff]  }
 0x1f0   :  { %v4849_v21 = vpop.f32.mrb[8].mxu1 }
 0x1f1   :  { %v4850_v22 = vpop.f32.mrb[9].mxu1 }
 0x1f2   :  { %3337 = vmatpush1.bf16.msra.mxu1 %v5448_v15  ;;  %3501 = vmatpush1.bf16.msra.mxu0 %v5451_v16  ;;  %v4851_v9 = vadd.f32 %v4850_v22, %v4849_v21  ;;  %v4852_v5 = vpop.f32.mrb[10].mxu1  ;;  %v5520_v15 = vld [vmem:[#allocation7 + $0x540] ss:$16 sps:$4 sm:$0xff]   ;;  %v5523_v16 = vld [vmem:[#allocation7 + $0x548] ss:$16 sps:$4 sm:$0xff]  }
 0x1f3   :  { %3338 = vmatprep.subr.bf16.mxu1 %v5456_v18  ;;  %3502 = vmatprep.subr.bf16.mxu0 %v5459_v19  ;;  %v4853_v54 = vpop.f32.mrb[11].mxu1  ;;  %v5531_v18 = vld [vmem:[#allocation7 + $0x56c] ss:$16 sps:$4 sm:$0xff]   ;;  %v5526_v19 = vld [vmem:[#allocation7 + $0x560] ss:$16 sps:$4 sm:$0xff]  }
 0x1f4   :  { %v6051_v30 = vadd.f32 %v4851_v9, %v1842_v20  ;;  %v5529_v20 = vld [vmem:[#allocation7 + $0x568] ss:$16 sps:$4 sm:$0xff]   ;;  %v5534_v21 = vld [vmem:[#allocation7 + $0x584] ss:$16 sps:$4 sm:$0xff]   ;;  %v5537_v22 = vld [vmem:[#allocation7 + $0x58c] ss:$16 sps:$4 sm:$0xff]  }
 0x1f5   :  { %v5540_v9 = vld [vmem:[#allocation7 + $0x5a4] ss:$16 sps:$4 sm:$0xff]   ;;  %v5543_v5 = vld [vmem:[#allocation7 + $0x5ac] ss:$16 sps:$4 sm:$0xff]   ;;  %v382_v54 = vsub.s32 5, %v6018_v44 }
 0x1f6   :  { %3339 = vmatpush1.bf16.msra.mxu1 %v5454_v23  ;;  %3503 = vmatpush1.bf16.msra.mxu0 %v5457_v24  ;;  %v5532_v23 = vld [vmem:[#allocation7 + $0x580] ss:$16 sps:$4 sm:$0xff]   ;;  %v5535_v24 = vld [vmem:[#allocation7 + $0x588] ss:$16 sps:$4 sm:$0xff]  }
 0x1f7   :  { %3349 = vmatprep.subr.bf16.mxu1 %v5462_v26  ;;  %3513 = vmatprep.subr.bf16.mxu0 %v5465_v27  ;;  %v5538_v26 = vld [vmem:[#allocation7 + $0x5a0] ss:$16 sps:$4 sm:$0xff]   ;;  %v5541_v27 = vld [vmem:[#allocation7 + $0x5a8] ss:$16 sps:$4 sm:$0xff]  }
 0x1f8   :  { %v5714_v44 = vld [vmem:[#allocation10 + $0x78] sm:$0xff]  }
 0x1f9   :  { %3341 = vmatmul.mubr.bf16.vlgmr.msra.gmra.mrb[12].mxu1 %v1896_v29  ;;  %3505 = vmatmul.mubr.bf16.vlgmr.msra.gmra.mrb[8].mxu0 %v1896_v29  ;;  %v379_v29 = vrot.slane %v6026_v46, %v378_v25  ;;  %v5606_v25 = vld [vmem:[#allocation8 + $0x4] ss:$8 sps:$4 sm:$0xff]  }
 0x1fa   :  { %3350 = vmatpush1.bf16.msra.mxu1 %v5460_v48  ;;  %3514 = vmatpush1.bf16.msra.mxu0 %v5463_v28  ;;  %v5546_v48 = vld [vmem:[#allocation7 + $0x5c4] ss:$16 sps:$4 sm:$0xff]   ;;  %v5549_v28 = vld [vmem:[#allocation7 + $0x5cc] ss:$16 sps:$4 sm:$0xff]  }
 0x1fb   :  { %3351 = vmatprep.subr.bf16.mxu1 %v5468_v31  ;;  %3515 = vmatprep.subr.bf16.mxu0 %v5471_v32  ;;  %v5544_v31 = vld [vmem:[#allocation7 + $0x5c0] ss:$16 sps:$4 sm:$0xff]   ;;  %v5547_v32 = vld [vmem:[#allocation7 + $0x5c8] ss:$16 sps:$4 sm:$0xff]  }
 0x1fe   :  { %3352 = vmatpush1.bf16.msra.mxu1 %v5466_v33  ;;  %3516 = vmatpush1.bf16.msra.mxu0 %v5469_v34  ;;  %v383_v33 = vrot.slane %v6026_v46, %v382_v54  ;;  %v5552_v34 = vld [vmem:[#allocation7 + $0x5e4] ss:$16 sps:$4 sm:$0xff]  }
 0x1ff   :  { %3353 = vmatprep.subr.bf16.mxu1 %v5474_v35  ;;  %3517 = vmatprep.subr.bf16.mxu0 %v5477_v36  ;;  %v5555_v35 = vld [vmem:[#allocation7 + $0x5ec] ss:$16 sps:$4 sm:$0xff]  }
 0x200   :  { %v5609_v54 = vld [vmem:[#allocation8 + $0x14] ss:$8 sps:$4 sm:$0xff]  }
 0x202   :  { %3354 = vmatpush1.bf16.msra.mxu1 %v5472_v37  ;;  %3518 = vmatpush1.bf16.msra.mxu0 %v5475_v38 }
 0x203   :  { %3355 = vmatprep.subr.bf16.mxu1 %v5480_v39  ;;  %3519 = vmatprep.subr.bf16.mxu0 %v5483_v40 }
 0x206   :  { %3356 = vmatpush1.bf16.msra.mxu1 %v5478_v41  ;;  %3520 = vmatpush1.bf16.msra.mxu0 %v5481_v42  ;;  %v5550_v41 = vld [vmem:[#allocation7 + $0x5e0] ss:$16 sps:$4 sm:$0xff]   ;;  %v5553_v42 = vld [vmem:[#allocation7 + $0x5e8] ss:$16 sps:$4 sm:$0xff]  }
 0x207   :  { %3357 = vmatprep.subr.bf16.mxu1 %v5486_v43  ;;  %3521 = vmatprep.subr.bf16.mxu0 %v5489_v50 }
 0x20a   :  { %3358 = vmatpush1.bf16.msra.mxu1 %v5484_v51  ;;  %3522 = vmatpush1.bf16.msra.mxu0 %v5487_v52  ;;  %v5558_v51 = vld [vmem:[#allocation7 + $0x604] ss:$16 sps:$4 sm:$0xff]   ;;  %v5561_v52 = vld [vmem:[#allocation7 + $0x60c] ss:$16 sps:$4 sm:$0xff]  }
 0x20b   :  { %3359 = vmatprep.subr.bf16.mxu1 %v5492_v53  ;;  %3523 = vmatprep.subr.bf16.mxu0 %v5495_v55  ;;  %v5556_v55 = vld [vmem:[#allocation7 + $0x600] ss:$16 sps:$4 sm:$0xff]  }
 0x20e   :  { %3360 = vmatpush1.bf16.msra.mxu1 %v5490_v56  ;;  %3524 = vmatpush1.bf16.msra.mxu0 %v5493_v57  ;;  %v5559_v56 = vld [vmem:[#allocation7 + $0x608] ss:$16 sps:$4 sm:$0xff]  }
 0x20f   :  { %3361 = vmatprep.subr.bf16.mxu1 %v5498_v58  ;;  %3525 = vmatprep.subr.bf16.mxu0 %v5501_v59  ;;  %v5564_v58 = vld [vmem:[#allocation7 + $0x624] ss:$16 sps:$4 sm:$0xff]   ;;  %v5567_v59 = vld [vmem:[#allocation7 + $0x62c] ss:$16 sps:$4 sm:$0xff]  }
 0x212   :  { %3362 = vmatpush1.bf16.msra.mxu1 %v5496_v60  ;;  %3526 = vmatpush1.bf16.msra.mxu0 %v5499_v61  ;;  %v5562_v60 = vld [vmem:[#allocation7 + $0x620] ss:$16 sps:$4 sm:$0xff]   ;;  %v5565_v61 = vld [vmem:[#allocation7 + $0x628] ss:$16 sps:$4 sm:$0xff]  }
 0x213   :  { %3363 = vmatprep.subr.bf16.mxu1 %v5504_v62  ;;  %3527 = vmatprep.subr.bf16.mxu0 %v5507_v63  ;;  %v5570_v62 = vld [vmem:[#allocation7 + $0x644] ss:$16 sps:$4 sm:$0xff]   ;;  %v5573_v63 = vld [vmem:[#allocation7 + $0x64c] ss:$16 sps:$4 sm:$0xff]  }
 0x216   :  { %3364 = vmatpush1.bf16.msra.mxu1 %v5502_v0  ;;  %3528 = vmatpush1.bf16.msra.mxu0 %v5505_v1  ;;  %v5869_v0 = vmov 0   ;;  %v5568_v1 = vld [vmem:[#allocation7 + $0x640] ss:$16 sps:$4 sm:$0xff]  }
 0x217   :  { %3365 = vmatprep.subr.bf16.mxu1 %v5510_v2  ;;  %3529 = vmatprep.subr.bf16.mxu0 %v5513_v4  ;;  %v5571_v2 = vld [vmem:[#allocation7 + $0x648] ss:$16 sps:$4 sm:$0xff]   ;;  %v5576_v4 = vld [vmem:[#allocation7 + $0x664] ss:$16 sps:$4 sm:$0xff]  }
 0x21a   :  { %3366 = vmatpush1.bf16.msra.mxu1 %v5508_v6  ;;  %3530 = vmatpush1.bf16.msra.mxu0 %v5511_v7  ;;  %v5579_v6 = vld [vmem:[#allocation7 + $0x66c] ss:$16 sps:$4 sm:$0xff]   ;;  %v5574_v7 = vld [vmem:[#allocation7 + $0x660] ss:$16 sps:$4 sm:$0xff]  }
 0x21b   :  { %3367 = vmatprep.subr.bf16.mxu1 %v5516_v8  ;;  %3531 = vmatprep.subr.bf16.mxu0 %v5519_v10  ;;  %v5577_v8 = vld [vmem:[#allocation7 + $0x668] ss:$16 sps:$4 sm:$0xff]   ;;  %v5582_v10 = vld [vmem:[#allocation7 + $0x684] ss:$16 sps:$4 sm:$0xff]  }
 0x21e   :  { %3368 = vmatpush1.bf16.msra.mxu1 %v5514_v11  ;;  %3532 = vmatpush1.bf16.msra.mxu0 %v5517_v12  ;;  %v5585_v11 = vld [vmem:[#allocation7 + $0x68c] ss:$16 sps:$4 sm:$0xff]   ;;  %v5580_v12 = vld [vmem:[#allocation7 + $0x680] ss:$16 sps:$4 sm:$0xff]  }
 0x21f   :  { %3369 = vmatprep.subr.bf16.mxu1 %v5522_v13  ;;  %3533 = vmatprep.subr.bf16.mxu0 %v5525_v14  ;;  %v5583_v13 = vld [vmem:[#allocation7 + $0x688] ss:$16 sps:$4 sm:$0xff]   ;;  %v5588_v14 = vld [vmem:[#allocation7 + $0x6a4] ss:$16 sps:$4 sm:$0xff]  }
 0x222   :  { %3370 = vmatpush1.bf16.msra.mxu1 %v5520_v15  ;;  %3534 = vmatpush1.bf16.msra.mxu0 %v5523_v16  ;;  %v5591_v15 = vld [vmem:[#allocation7 + $0x6ac] ss:$16 sps:$4 sm:$0xff]   ;;  %v5586_v16 = vld [vmem:[#allocation7 + $0x6a0] ss:$16 sps:$4 sm:$0xff]  }
 0x223   :  { %3371 = vmatprep.subr.bf16.mxu1 %v5528_v17  ;;  %3535 = vmatprep.subr.bf16.mxu0 %v5531_v18  ;;  %v5589_v17 = vld [vmem:[#allocation7 + $0x6a8] ss:$16 sps:$4 sm:$0xff]   ;;  %v5594_v18 = vld [vmem:[#allocation7 + $0x6c4] ss:$16 sps:$4 sm:$0xff]  }
 0x226   :  { %3372 = vmatpush1.bf16.msra.mxu1 %v5526_v19  ;;  %3536 = vmatpush1.bf16.msra.mxu0 %v5529_v20  ;;  %v5597_v19 = vld [vmem:[#allocation7 + $0x6cc] ss:$16 sps:$4 sm:$0xff]   ;;  %v5592_v20 = vld [vmem:[#allocation7 + $0x6c0] ss:$16 sps:$4 sm:$0xff]  }
 0x227   :  { %3373 = vmatprep.subr.bf16.mxu1 %v5534_v21  ;;  %3537 = vmatprep.subr.bf16.mxu0 %v5537_v22  ;;  %v5595_v21 = vld [vmem:[#allocation7 + $0x6c8] ss:$16 sps:$4 sm:$0xff]   ;;  %v5600_v22 = vld [vmem:[#allocation7 + $0x6e4] ss:$16 sps:$4 sm:$0xff]  }
 0x22a   :  { %3374 = vmatpush1.bf16.msra.mxu1 %v5532_v23  ;;  %3538 = vmatpush1.bf16.msra.mxu0 %v5535_v24  ;;  %v5603_v23 = vld [vmem:[#allocation7 + $0x6ec] ss:$16 sps:$4 sm:$0xff]   ;;  %v5598_v24 = vld [vmem:[#allocation7 + $0x6e0] ss:$16 sps:$4 sm:$0xff]  }
 0x22b   :  { %3375 = vmatprep.subr.bf16.mxu1 %v5540_v9  ;;  %3539 = vmatprep.subr.bf16.mxu0 %v5543_v5  ;;  %v5601_v9 = vld [vmem:[#allocation7 + $0x6e8] ss:$16 sps:$4 sm:$0xff]   ;;  %v1893_v5 = vmax.f32 %v6051_v30, 0.0 }
 0x22c   :  { %v5613_v30 = vld [vmem:[#allocation8 + $0x30] ss:$8 sps:$4 sm:$0xff]  }
 0x22e   :  { %3376 = vmatpush1.bf16.msra.mxu1 %v5538_v26  ;;  %3540 = vmatpush1.bf16.msra.mxu0 %v5541_v27  ;;  %v5604_v26 = vld [vmem:[#allocation8] ss:$8 sps:$4 sm:$0xff]   ;;  %v1900_v27 = vpack.c.bf16 %v1893_v5, %v1893_v5 }
 0x22f   :  { %3377 = vmatprep.subr.bf16.mxu1 %v5546_v48  ;;  %3541 = vmatprep.subr.bf16.mxu0 %v5549_v28  ;;  %v5607_v48 = vld [vmem:[#allocation8 + $0x10] ss:$8 sps:$4 sm:$0xff]   ;;  %v5612_v28 = vld [vmem:[#allocation8 + $0x24] ss:$8 sps:$4 sm:$0xff]  }
 0x230   :  { %v1800_v36 = vpop.f32.mrb[4].mxu0 }
 0x231   :  { %v4881_v37 = vadd.f32 %v1800_v36, %v379_v29  ;;  %v1802_v38 = vpop.f32.mrb[5].mxu0  ;;  %v5610_v29 = vld [vmem:[#allocation8 + $0x20] ss:$8 sps:$4 sm:$0xff]   ;;  %v5624_v36 = vld [vmem:[#allocation8 + $0x64] ss:$8 sps:$4 sm:$0xff]  }
 0x232   :  { %v4882_v39 = vadd.f32 %v1802_v38, %v383_v33  ;;  %3378 = vmatpush1.bf16.msra.mxu1 %v5544_v31  ;;  %3542 = vmatpush1.bf16.msra.mxu0 %v5547_v32  ;;  %v1804_v40 = vpop.f32.mrb[6].mxu0  ;;  %v5615_v31 = vld [vmem:[#allocation8 + $0x34] ss:$8 sps:$4 sm:$0xff]   ;;  %v5618_v32 = vld [vmem:[#allocation8 + $0x44] ss:$8 sps:$4 sm:$0xff]  }
 0x233   :  { %v1891_v43 = vmax.f32 %v4881_v37, 0.0  ;;  %v1805_v50 = vpop.f32.mrb[7].mxu0  ;;  %3379 = vmatprep.subr.bf16.mxu1 %v5552_v34  ;;  %3543 = vmatprep.subr.bf16.mxu0 %v5555_v35  ;;  %v5616_v33 = vld [vmem:[#allocation8 + $0x40] ss:$8 sps:$4 sm:$0xff]   ;;  %v5621_v34 = vld [vmem:[#allocation8 + $0x54] ss:$8 sps:$4 sm:$0xff]  }
 0x234   :  { %v1892_v46 = vmax.f32 %v4882_v39, 0.0  ;;  %v5619_v35 = vld [vmem:[#allocation8 + $0x50] ss:$8 sps:$4 sm:$0xff]   ;;  %v5622_v37 = vld [vmem:[#allocation8 + $0x60] ss:$8 sps:$4 sm:$0xff]  }
 0x235   :  { %v1898_v57 = vpack.c.bf16 %v1891_v43, %v1891_v43  ;;  %v5627_v38 = vld [vmem:[#allocation8 + $0x74] ss:$8 sps:$4 sm:$0xff]   ;;  %v5625_v39 = vld [vmem:[#allocation8 + $0x70] ss:$8 sps:$4 sm:$0xff]   ;;  %v5630_v40 = vld [vmem:[#allocation8 + $0x84] ss:$8 sps:$4 sm:$0xff]  }
 0x236   :  { %v1899_v53 = vpack.c.bf16 %v1892_v46, %v1892_v46  ;;  %3380 = vmatpush1.bf16.msra.mxu1 %v5550_v41  ;;  %3544 = vmatpush1.bf16.msra.mxu0 %v5553_v42  ;;  %v5628_v41 = vld [vmem:[#allocation8 + $0x80] ss:$8 sps:$4 sm:$0xff]   ;;  %v5633_v42 = vld [vmem:[#allocation8 + $0x94] ss:$8 sps:$4 sm:$0xff]   ;;  %v5631_v43 = vld [vmem:[#allocation8 + $0x90] ss:$8 sps:$4 sm:$0xff]  }
 0x237   :  { %3390 = vmatprep.subr.bf16.mxu1 %v5558_v51  ;;  %3554 = vmatprep.subr.bf16.mxu0 %v5561_v52  ;;  %v5636_v50 = vld [vmem:[#allocation8 + $0xa4] ss:$8 sps:$4 sm:$0xff]   ;;  %v5634_v51 = vld [vmem:[#allocation8 + $0xa0] ss:$8 sps:$4 sm:$0xff]   ;;  %v5639_v52 = vld [vmem:[#allocation8 + $0xb4] ss:$8 sps:$4 sm:$0xff]  }
 0x238   :  { %3381 = vmatprep.mubr.bf16.mxu1 %v1899_v53  ;;  %3545 = vmatprep.mubr.bf16.mxu0 %v1899_v53  ;;  %v5637_v46 = vld [vmem:[#allocation8 + $0xb0] ss:$8 sps:$4 sm:$0xff]   ;;  %v5642_v53 = vld [vmem:[#allocation8 + $0xc4] ss:$8 sps:$4 sm:$0xff]  }
 0x239   :  { %3382 = vmatmul.mubr.bf16.vlgmr.msra.gmra.mrb[12].mxu1 %v1898_v57  ;;  %3546 = vmatmul.mubr.bf16.vlgmr.msra.gmra.mrb[8].mxu0 %v1898_v57  ;;  %v5643_v57 = vld [vmem:[#allocation8 + $0xd0] ss:$8 sps:$4 sm:$0xff]  }
 0x23a   :  { %3391 = vmatpush1.bf16.msra.mxu1 %v5556_v55  ;;  %3555 = vmatpush1.bf16.msra.mxu0 %v5559_v56  ;;  %v5640_v55 = vld [vmem:[#allocation8 + $0xc0] ss:$8 sps:$4 sm:$0xff]   ;;  %v5645_v56 = vld [vmem:[#allocation8 + $0xd4] ss:$8 sps:$4 sm:$0xff]  }
 0x23b   :  { %3392 = vmatprep.subr.bf16.mxu1 %v5564_v58  ;;  %3556 = vmatprep.subr.bf16.mxu0 %v5567_v59  ;;  %v5648_v58 = vld [vmem:[#allocation8 + $0xe4] ss:$8 sps:$4 sm:$0xff]   ;;  %v5646_v59 = vld [vmem:[#allocation8 + $0xe0] ss:$8 sps:$4 sm:$0xff]  }
 0x23c   :  { %3422 = vmatprep.mubr.bf16.mxu1 %v5869_v0  ;;  %3586 = vmatprep.mubr.bf16.mxu0 %v5869_v0  ;;  %v5701_v0 = vld [vmem:[#allocation10] sm:$0xff]  }
 0x23e   :  { %3393 = vmatpush1.bf16.msra.mxu1 %v5562_v60  ;;  %3557 = vmatpush1.bf16.msra.mxu0 %v5565_v61  ;;  %v5651_v60 = vld [vmem:[#allocation8 + $0xf4] ss:$8 sps:$4 sm:$0xff]   ;;  %v5649_v61 = vld [vmem:[#allocation8 + $0xf0] ss:$8 sps:$4 sm:$0xff]  }
 0x23f   :  { %3394 = vmatprep.subr.bf16.mxu1 %v5570_v62  ;;  %3558 = vmatprep.subr.bf16.mxu0 %v5573_v63  ;;  %v5654_v62 = vld [vmem:[#allocation8 + $0x104] ss:$8 sps:$4 sm:$0xff]  }
 0x240   :  { %v5700_v63 = vld [vmem:[#allocation10 + $0x40] sm:$0xff]  }
 0x242   :  { %3395 = vmatpush1.bf16.msra.mxu1 %v5568_v1  ;;  %3559 = vmatpush1.bf16.msra.mxu0 %v5571_v2  ;;  %v5702_v1 = vld [vmem:[#allocation10 + $0x48] sm:$0xff]  }
 0x243   :  { %3396 = vmatprep.subr.bf16.mxu1 %v5576_v4  ;;  %3560 = vmatprep.subr.bf16.mxu0 %v5579_v6  ;;  %v5703_v2 = vld [vmem:[#allocation10 + $0x8] sm:$0xff]   ;;  %v5704_v4 = vld [vmem:[#allocation10 + $0x50] sm:$0xff]  }
 0x244   :  { %v5705_v6 = vld [vmem:[#allocation10 + $0x10] sm:$0xff]  }
 0x246   :  { %3397 = vmatpush1.bf16.msra.mxu1 %v5574_v7  ;;  %3561 = vmatpush1.bf16.msra.mxu0 %v5577_v8  ;;  %v5706_v7 = vld [vmem:[#allocation10 + $0x58] sm:$0xff]  }
 0x247   :  { %3398 = vmatprep.subr.bf16.mxu1 %v5582_v10  ;;  %3562 = vmatprep.subr.bf16.mxu0 %v5585_v11  ;;  %v5707_v8 = vld [vmem:[#allocation10 + $0x18] sm:$0xff]   ;;  %v5708_v10 = vld [vmem:[#allocation10 + $0x60] sm:$0xff]  }
 0x248   :  { %v5709_v11 = vld [vmem:[#allocation10 + $0x20] sm:$0xff]  }
 0x24a   :  { %3399 = vmatpush1.bf16.msra.mxu1 %v5580_v12  ;;  %3563 = vmatpush1.bf16.msra.mxu0 %v5583_v13  ;;  %v5710_v12 = vld [vmem:[#allocation10 + $0x68] sm:$0xff]  }
 0x24b   :  { %3400 = vmatprep.subr.bf16.mxu1 %v5588_v14  ;;  %3564 = vmatprep.subr.bf16.mxu0 %v5591_v15  ;;  %v5711_v13 = vld [vmem:[#allocation10 + $0x28] sm:$0xff]   ;;  %v6061_v14 = vld [vmem:[%s6100_s4] sm:$0xf] }
 0x24c   :  { %v2130_v15 = vrot.slane %v6061_v14, %v6021_v45 }
 0x24e   :  { %3401 = vmatpush1.bf16.msra.mxu1 %v5586_v16  ;;  %3565 = vmatpush1.bf16.msra.mxu0 %v5589_v17  ;;  %v2134_v16 = vrot.slane %v6061_v14, %v6029_v47  ;;  %v2142_v17 = vrot.slane %v6061_v14, %v374_v49 }
 0x24f   :  { %3402 = vmatprep.subr.bf16.mxu1 %v5594_v18  ;;  %3566 = vmatprep.subr.bf16.mxu0 %v5597_v19 }
 0x252   :  { %3403 = vmatpush1.bf16.msra.mxu1 %v5592_v20  ;;  %3567 = vmatpush1.bf16.msra.mxu0 %v5595_v21 }
 0x253   :  { %3404 = vmatprep.subr.bf16.mxu1 %v5600_v22  ;;  %3568 = vmatprep.subr.bf16.mxu0 %v5603_v23 }
 0x256   :  { %3405 = vmatpush1.bf16.msra.mxu1 %v5598_v24  ;;  %3569 = vmatpush1.bf16.msra.mxu0 %v5601_v9 }
 0x257   :  { %3999 = vmatprep.subr.bf16.mxu1 %v5606_v25  ;;  %4855 = vmatprep.subr.bf16.mxu0 %v5700_v63  ;;  %v2138_v63 = vrot.slane %v6061_v14, %v370_v3  ;;  %v5715_v3 = vld [vmem:[#allocation10 + $0x38] sm:$0xff]  }
 0x259   :  { %3423 = vmatmul.mubr.bf16.vlgmr.msra.gmra.mrb[12].mxu1 %v1900_v27  ;;  %3587 = vmatmul.mubr.bf16.vlgmr.msra.gmra.mrb[8].mxu0 %v1900_v27 }
 0x25a   :  { %4000 = vmatpush1.bf16.msra.mxu1 %v5604_v26  ;;  %4856 = vmatpush3.bf16.msra.mxu0 %v5701_v0  ;;  %v5696_v0 = vld [vmem:[#allocation8 + $0x1e4] ss:$8 sps:$4 sm:$0xff]  }
 0x25b   :  { %4001 = vmatprep.subr.bf16.mxu1 %v5609_v54  ;;  %4857 = vmatprep.subr.bf16.mxu0 %v5702_v1  ;;  %v5694_v1 = vld [vmem:[#allocation8 + $0x1e0] ss:$8 sps:$4 sm:$0xff]  }
 0x25e   :  { %4002 = vmatpush1.bf16.msra.mxu1 %v5607_v48  ;;  %4858 = vmatpush3.bf16.msra.mxu0 %v5703_v2 }
 0x25f   :  { %4003 = vmatprep.subr.bf16.mxu1 %v5612_v28  ;;  %4859 = vmatprep.subr.bf16.mxu0 %v5704_v4  ;;  %v5699_v4 = vld [vmem:[#allocation8 + $0x1f4] ss:$8 sps:$4 sm:$0xff]  }
 0x262   :  { %4004 = vmatpush1.bf16.msra.mxu1 %v5610_v29  ;;  %4860 = vmatpush3.bf16.msra.mxu0 %v5705_v6  ;;  %v5652_v29 = vld [vmem:[#allocation8 + $0x100] ss:$8 sps:$4 sm:$0xff]   ;;  %v5697_v6 = vld [vmem:[#allocation8 + $0x1f0] ss:$8 sps:$4 sm:$0xff]  }
 0x263   :  { %4005 = vmatprep.subr.bf16.mxu1 %v5615_v31  ;;  %4861 = vmatprep.subr.bf16.mxu0 %v5706_v7 }
 0x266   :  { %4006 = vmatpush1.bf16.msra.mxu1 %v5613_v30  ;;  %4862 = vmatpush3.bf16.msra.mxu0 %v5707_v8  ;;  %v5657_v30 = vld [vmem:[#allocation8 + $0x114] ss:$8 sps:$4 sm:$0xff]  }
 0x267   :  { %4007 = vmatprep.subr.bf16.mxu1 %v5618_v32  ;;  %4863 = vmatprep.subr.bf16.mxu0 %v5708_v10  ;;  %v5655_v32 = vld [vmem:[#allocation8 + $0x110] ss:$8 sps:$4 sm:$0xff]  }
 0x268   :  { %v5712_v10 = vld [vmem:[#allocation10 + $0x70] sm:$0xff]  }
 0x26a   :  { %4008 = vmatpush1.bf16.msra.mxu1 %v5616_v33  ;;  %4864 = vmatpush3.bf16.msra.mxu0 %v5709_v11  ;;  %v5660_v33 = vld [vmem:[#allocation8 + $0x124] ss:$8 sps:$4 sm:$0xff]   ;;  %v5713_v11 = vld [vmem:[#allocation10 + $0x30] sm:$0xff]  }
 0x26b   :  { %4009 = vmatprep.subr.bf16.mxu1 %v5621_v34  ;;  %4865 = vmatprep.subr.bf16.mxu0 %v5710_v12  ;;  %v5658_v34 = vld [vmem:[#allocation8 + $0x120] ss:$8 sps:$4 sm:$0xff]   ;;  %v3667_v12 = vld [vmem:[%s6102_s6] sm:$0x3]  ;;  %s5870_s6 = smov [#allocation11]  }
 0x26c   :  { %v3676_v14 = vrot.slane %v3667_v12, %v6029_v47  ;;  %s4267_s10 = sshll.u32 %s5870_s6, 4  ;;  %s4268_s10 = int_to_ptr.vmem [resolvable:$true] %s4267_s10 }
 0x26d   :  { %s5826_s13 = scalar_lea.vmem %s4268_s10, 128  ;;  %p5831_p13 = scmp.lt.s32.totalorder %s4268_s10, %s4268_s10 }
 0x26e   :  { %4010 = vmatpush1.bf16.msra.mxu1 %v5619_v35  ;;  %4866 = vmatpush3.bf16.msra.mxu0 %v5711_v13  ;;  %v5663_v35 = vld [vmem:[#allocation8 + $0x134] ss:$8 sps:$4 sm:$0xff]   ;;  %v3672_v13 = vrot.slane %v3667_v12, %v6021_v45  ;;  %p5827_p12 = scmp.ne.s32.totalorder %s4268_s10, %s5826_s13  ;;  %p5832_p0 = scmp.lt.s32.totalorder %s5826_s13, %s5826_s13 }
 0x26f   :  { %4011 = vmatprep.subr.bf16.mxu1 %v5624_v36  ;;  %v5661_v36 = vld [vmem:[#allocation8 + $0x130] ss:$8 sps:$4 sm:$0xff]   ;;  %4867 = vmatprep.subr.bf16.mxu0 %v5712_v10 }
 0x270   :  { %p5833_p1 = por %p5832_p0, %p5831_p13 }
 0x272   :  { %4012 = vmatpush1.bf16.msra.mxu1 %v5622_v37  ;;  %v5666_v37 = vld [vmem:[#allocation8 + $0x144] ss:$8 sps:$4 sm:$0xff]   ;;  %4868 = vmatpush3.bf16.msra.mxu0 %v5713_v11  ;;  %p5834_p2 = pnand %p5833_p1, %p5827_p12 }
 0x273   :  { %4013 = vmatprep.subr.bf16.mxu1 %v5627_v38  ;;  %v5664_v38 = vld [vmem:[#allocation8 + $0x140] ss:$8 sps:$4 sm:$0xff]   ;;  %4869 = vmatprep.subr.bf16.mxu0 %v5714_v44 }
 0x276   :  { %4014 = vmatpush1.bf16.msra.mxu1 %v5625_v39  ;;  %v5669_v39 = vld [vmem:[#allocation8 + $0x154] ss:$8 sps:$4 sm:$0xff]   ;;  %4870 = vmatpush3.bf16.msra.mxu0 %v5715_v3 }
 0x277   :  { %4015 = vmatprep.subr.bf16.mxu1 %v5630_v40  ;;  %v5667_v40 = vld [vmem:[#allocation8 + $0x150] ss:$8 sps:$4 sm:$0xff]  }
 0x27a   :  { %4016 = vmatpush1.bf16.msra.mxu1 %v5628_v41  ;;  %v5672_v41 = vld [vmem:[#allocation8 + $0x164] ss:$8 sps:$4 sm:$0xff]  }
 0x27b   :  { %4017 = vmatprep.subr.bf16.mxu1 %v5633_v42  ;;  %v5670_v42 = vld [vmem:[#allocation8 + $0x160] ss:$8 sps:$4 sm:$0xff]  }
 0x27e   :  { %4018 = vmatpush1.bf16.msra.mxu1 %v5631_v43  ;;  %v5675_v43 = vld [vmem:[#allocation8 + $0x174] ss:$8 sps:$4 sm:$0xff]  }
 0x27f   :  { %4019 = vmatprep.subr.bf16.mxu1 %v5636_v50  ;;  %v5673_v50 = vld [vmem:[#allocation8 + $0x170] ss:$8 sps:$4 sm:$0xff]  }
 0x282   :  { %4020 = vmatpush1.bf16.msra.mxu1 %v5634_v51  ;;  %v5678_v51 = vld [vmem:[#allocation8 + $0x184] ss:$8 sps:$4 sm:$0xff]  }
 0x283   :  { %4021 = vmatprep.subr.bf16.mxu1 %v5639_v52  ;;  %v5676_v52 = vld [vmem:[#allocation8 + $0x180] ss:$8 sps:$4 sm:$0xff]  }
 0x286   :  { %4022 = vmatpush1.bf16.msra.mxu1 %v5637_v46  ;;  %v5681_v46 = vld [vmem:[#allocation8 + $0x194] ss:$8 sps:$4 sm:$0xff]  }
 0x287   :  { %4023 = vmatprep.subr.bf16.mxu1 %v5642_v53  ;;  %v5679_v53 = vld [vmem:[#allocation8 + $0x190] ss:$8 sps:$4 sm:$0xff]  }
 0x28a   :  { %4024 = vmatpush1.bf16.msra.mxu1 %v5640_v55  ;;  %v5684_v55 = vld [vmem:[#allocation8 + $0x1a4] ss:$8 sps:$4 sm:$0xff]  }
 0x28b   :  { %4025 = vmatprep.subr.bf16.mxu1 %v5645_v56  ;;  %v5682_v56 = vld [vmem:[#allocation8 + $0x1a0] ss:$8 sps:$4 sm:$0xff]  }
 0x28e   :  { %4026 = vmatpush1.bf16.msra.mxu1 %v5643_v57  ;;  %v5687_v57 = vld [vmem:[#allocation8 + $0x1b4] ss:$8 sps:$4 sm:$0xff]  }
 0x28f   :  { %4027 = vmatprep.subr.bf16.mxu1 %v5648_v58  ;;  %v5685_v58 = vld [vmem:[#allocation8 + $0x1b0] ss:$8 sps:$4 sm:$0xff]  }
 0x292   :  { %4028 = vmatpush1.bf16.msra.mxu1 %v5646_v59  ;;  %v5690_v59 = vld [vmem:[#allocation8 + $0x1c4] ss:$8 sps:$4 sm:$0xff]  }
 0x293   :  { %4029 = vmatprep.subr.bf16.mxu1 %v5651_v60  ;;  %v5688_v60 = vld [vmem:[#allocation8 + $0x1c0] ss:$8 sps:$4 sm:$0xff]  }
 0x296   :  { %4030 = vmatpush1.bf16.msra.mxu1 %v5649_v61  ;;  %v5693_v61 = vld [vmem:[#allocation8 + $0x1d4] ss:$8 sps:$4 sm:$0xff]  }
 0x297   :  { %4040 = vmatprep.subr.bf16.mxu1 %v5654_v62  ;;  %v5691_v62 = vld [vmem:[#allocation8 + $0x1d0] ss:$8 sps:$4 sm:$0xff]  }
 0x32c   :  { %v3424_v18 = vpop.f32.mrb[12].mxu1  ;;  %v6070_v19 = vpop.f32.mrb[8].mxu0 }
 0x32d   :  { %v4883_v20 = vadd.f32 %v3424_v18, %v2130_v15  ;;  %v3426_v21 = vpop.f32.mrb[13].mxu1  ;;  %v3590_v22 = vpop.f32.mrb[9].mxu0  ;;  %v4885_v2 = vadd.f32 %v6070_v19, %v2138_v63 }
 0x32e   :  { %v4884_v23 = vadd.f32 %v3426_v21, %v2134_v16  ;;  %v4886_v24 = vadd.f32 %v3590_v22, %v2142_v17  ;;  %v3428_v9 = vpop.f32.mrb[14].mxu1  ;;  %v3592_v5 = vpop.f32.mrb[10].mxu0 }
 0x32f   :  { %v3595_v25 = vmax.f32 %v4883_v20, 0.0  ;;  %v3429_v26 = vpop.f32.mrb[15].mxu1  ;;  %v3593_v27 = vpop.f32.mrb[11].mxu0  ;;  %v3597_v7 = vmax.f32 %v4885_v2, 0.0  ;;  %v4794_v5 = vld [vmem:[%s6104_s8] ss:$0 sm:$0xff] }
 0x330   :  { %v3596_v54 = vmax.f32 %v4884_v23, 0.0  ;;  %v3598_v48 = vmax.f32 %v4886_v24, 0.0 }
 0x331   :  { %v3599_v31 = vpack.c.bf16 %v3595_v25, %v3595_v25  ;;  %v3601_v8 = vpack.c.bf16 %v3597_v7, %v3597_v7 }
 0x332   :  { %v3600_v28 = vpack.c.bf16 %v3596_v54, %v3596_v54  ;;  %v3602_v49 = vpack.c.bf16 %v3598_v48, %v3598_v48 }
 0x334   :  { %4031 = vmatprep.mubr.bf16.mxu1 %v3600_v28 }
 0x335   :  { %4032 = vmatmul.mubr.bf16.vlgmr.msra.gmra.mrb[16].mxu1 %v3599_v31 }
 0x336   :  { %4041 = vmatpush1.bf16.msra.mxu1 %v5652_v29  ;;  %4072 = vmatprep.mubr.bf16.mxu1 %v3602_v49 }
 0x337   :  { %4042 = vmatprep.subr.bf16.mxu1 %v5657_v30 }
 0x33a   :  { %4043 = vmatpush1.bf16.msra.mxu1 %v5655_v32 }
 0x33b   :  { %4044 = vmatprep.subr.bf16.mxu1 %v5660_v33 }
 0x33e   :  { %4045 = vmatpush1.bf16.msra.mxu1 %v5658_v34 }
 0x33f   :  { %4046 = vmatprep.subr.bf16.mxu1 %v5663_v35 }
 0x342   :  { %4047 = vmatpush1.bf16.msra.mxu1 %v5661_v36 }
 0x343   :  { %4048 = vmatprep.subr.bf16.mxu1 %v5666_v37 }
 0x346   :  { %4049 = vmatpush1.bf16.msra.mxu1 %v5664_v38 }
 0x347   :  { %4050 = vmatprep.subr.bf16.mxu1 %v5669_v39 }
 0x34a   :  { %4051 = vmatpush1.bf16.msra.mxu1 %v5667_v40 }
 0x34b   :  { %4052 = vmatprep.subr.bf16.mxu1 %v5672_v41 }
 0x34e   :  { %4053 = vmatpush1.bf16.msra.mxu1 %v5670_v42 }
 0x34f   :  { %4054 = vmatprep.subr.bf16.mxu1 %v5675_v43 }
 0x352   :  { %4055 = vmatpush1.bf16.msra.mxu1 %v5673_v50 }
 0x353   :  { %4056 = vmatprep.subr.bf16.mxu1 %v5678_v51 }
 0x356   :  { %4057 = vmatpush1.bf16.msra.mxu1 %v5676_v52 }
 0x357   :  { %4058 = vmatprep.subr.bf16.mxu1 %v5681_v46 }
 0x35a   :  { %4059 = vmatpush1.bf16.msra.mxu1 %v5679_v53 }
 0x35b   :  { %4060 = vmatprep.subr.bf16.mxu1 %v5684_v55 }
 0x35e   :  { %4061 = vmatpush1.bf16.msra.mxu1 %v5682_v56 }
 0x35f   :  { %4062 = vmatprep.subr.bf16.mxu1 %v5687_v57 }
 0x362   :  { %4063 = vmatpush1.bf16.msra.mxu1 %v5685_v58 }
 0x363   :  { %4064 = vmatprep.subr.bf16.mxu1 %v5690_v59 }
 0x366   :  { %4065 = vmatpush1.bf16.msra.mxu1 %v5688_v60 }
 0x367   :  { %4066 = vmatprep.subr.bf16.mxu1 %v5693_v61 }
 0x36a   :  { %4067 = vmatpush1.bf16.msra.mxu1 %v5691_v62 }
 0x36b   :  { %4068 = vmatprep.subr.bf16.mxu1 %v5696_v0 }
 0x36e   :  { %4069 = vmatpush1.bf16.msra.mxu1 %v5694_v1 }
 0x36f   :  { %4070 = vmatprep.subr.bf16.mxu1 %v5699_v4 }
 0x372   :  { %4071 = vmatpush1.bf16.msra.mxu1 %v5697_v6 }
 0x375   :  { %4073 = vmatmul.mubr.bf16.vlgmr.msra.gmra.mrb[16].mxu1 %v3601_v8 }
 0x448   :  { %v4074_v15 = vpop.f32.mrb[16].mxu1 }
 0x449   :  { %v4887_v16 = vadd.f32 %v4074_v15, %v3672_v13  ;;  %v4076_v17 = vpop.f32.mrb[17].mxu1 }
 0x44a   :  { %v4888_v18 = vadd.f32 %v4076_v17, %v3676_v14  ;;  %v4078_v19 = vpop.f32.mrb[18].mxu1 }
 0x44b   :  { %v4081_v20 = vmax.f32 %v4887_v16, 0.0  ;;  %v4079_v21 = vpop.f32.mrb[19].mxu1 }
 0x44c   :  { %v4082_v22 = vmax.f32 %v4888_v18, 0.0 }
 0x44d   :  { %v4083_v24 = vpack.c.bf16 %v4081_v20, %v4081_v20 }
 0x44e   :  { %v4084_v23 = vpack.c.bf16 %v4082_v22, %v4082_v22 }
 0x450   :  { %4252 = vmatprep.mubr.bf16.mxu0 %v4084_v23 }
 0x451   :  { %4253 = vmatmul.mubr.bf16.vlgmr.msra.gmra.mrb[12].mxu0 %v4083_v24 }
 0x524   :  { %v4871_v9 = vpop.f32.mrb[12].mxu0 }
 0x525   :  { %v4872_v45 = vpop.f32.mrb[13].mxu0 }
 0x526   :  { %v4873_v47 = vadd.f32 %v4872_v45, %v4871_v9  ;;  %v4874_v25 = vpop.f32.mrb[14].mxu0 }
 0x527   :  { %v4875_v26 = vpop.f32.mrb[15].mxu0 }
 0x528   :  { %v4255_v27 = vadd.f32 %v4873_v47, %v4794_v5 }
 0x52a   :  { %4260 = vst [vmem:[#allocation11] sm:$0xff] %v4255_v27 }
 0x52b   :  { %5837 = shalt.err (!%p5834_p2)
}
 0x52c   :  { %s5838_s8 = scalar_lea.hbm %s6105_s9, 128 }
 0x52d   :  { %p5839_p3 = scmp.ne.s32.totalorder %s6105_s9, %s5838_s8  ;;  %p5842_p4 = scmp.lt.u32.totalorder %s5838_s8, %s6105_s9 }
 0x52f   :  { %p5844_p5 = pnand %p5842_p4, %p5839_p3 }
 0x531   :  { %5847 = shalt.err (!%p5844_p5)
}
 0x532   :  { %4270 = dma.vmem_to_hbm [thread:$0]  %s4268_s10, 128, %s6105_s9, [#allocation4]  }
 0x533   :  { %5854 = dma.done.wait [#allocation4], 128  }
 0x534   :  { %5855 = vsyncadd [#allocation4], 4294967168 }
 0x535   :  { %4274 = vsyncpa [#allocation3], 1 }
 0x536   :  { %4275 = vsyncpa [#allocation6], 1 }
 0x537   :  { %4276 = vsyncpa [#allocation9], 1 }
 0x538   :  { %4277 = vsyncpa [#allocation4], 1 }

</bundles_post_ra>
